<compile_context>
chip_gen: v6e
topology: v6e:2x2x1
jax: 0.10.0
libtpu: 0.0.40
codegen_flags: <defaults>
</compile_context>

<pallas_src>
import jax
import jax.numpy as jnp
from jax.experimental import pallas as pl
from jax.experimental.pallas import tpu as pltpu


def _round_up(x, m):
    return (x + m - 1) // m * m


def make_decoder_kernel(S, Bp, Hp, Zp, L):
    """Whole Decoder forward in one kernel call (no grid; everything fits VMEM)."""

    def kernel(x_ref, wih_ref, whh_ref, b_ref, fcw_ref, fcb_ref, out_ref):
        # Running sequence (input of the current RNN layer), kept as a value.
        # (S*Bp, Hp): Bp=8 sublanes / Hp=128 lanes -> each time step is an
        # exact stack of vreg tiles.
        seq = x_ref[...]

        # TODO(synk): a layer/time wavefront could shorten the 3 serial
        # h@W_hh chains to S+L-1 steps, but it conflicts with batching the
        # input projection; with S=8, L=3 the hoisted-projection form is
        # already latency-light and launch-overhead dominated.
        for l in range(L):                                  # static layer unroll
            # One batched MXU matmul for the whole layer's input projection
            # (replaces S tiny per-step dots); bias was pre-summed host-side.
            pre = (jnp.dot(seq, wih_ref[l],
                           preferred_element_type=jnp.float32)
                   + b_ref[l])                              # (S*Bp, Hp)
            w_hh = whh_ref[l]                               # loaded once per layer

            h = jnp.zeros((Bp, Hp), jnp.float32)            # h0 = 0 (PyTorch default)
            outs = []
            for t in range(S):                              # static time unroll
                # Static slice on an (8, 128)-tile boundary: no repack.
                h = jnp.tanh(pre[t * Bp:(t + 1) * Bp, :]
                             + jnp.dot(h, w_hh,
                                       preferred_element_type=jnp.float32))
                outs.append(h)
            seq = jnp.concatenate(outs, axis=0)             # (S*Bp, Hp)

        # Fused final Linear: one batched MXU matmul + lane-dense store.
        y = (jnp.dot(seq, fcw_ref[...], preferred_element_type=jnp.float32)
             + fcb_ref[...])                                # (S*Bp, Zp)
        out_ref[...] = y.astype(out_ref.dtype)

    return kernel


@jax.jit
def decoder_forward(x_enc, params):
    S, B, H = x_enc.shape
    L = params["w_ih_t"].shape[0]
    Z = params["fc_w_t"].shape[1]

    # Pad to sublane (8) / lane (128) boundaries; padded rows/cols are zero so
    # padded hidden lanes stay exactly zero and valid outputs are unchanged.
    Bp = _round_up(max(B, 8), 8)
    Hp = _round_up(max(H, 128), 128)
    Zp = _round_up(max(Z, 128), 128)

    f32 = jnp.float32
    x_p = jnp.zeros((S, Bp, Hp), f32).at[:, :B, :H].set(x_enc.astype(f32))
    x_p = x_p.reshape(S * Bp, Hp)                           # flat slab for the kernel
    wih = jnp.zeros((L, Hp, Hp), f32).at[:, :H, :H].set(params["w_ih_t"])
    whh = jnp.zeros((L, Hp, Hp), f32).at[:, :H, :H].set(params["w_hh_t"])
    b = jnp.zeros((L, 1, Hp), f32).at[:, :, :H].set(
        params["b_ih"] + params["b_hh"])                    # pre-summed biases
    fcw = jnp.zeros((Hp, Zp), f32).at[:H, :Z].set(params["fc_w_t"])
    fcb = jnp.zeros((1, Zp), f32).at[:, :Z].set(params["fc_b"])

    vmem = pl.BlockSpec(memory_space=pltpu.MemorySpace.VMEM)
    out_p = pl.pallas_call(
        make_decoder_kernel(S, Bp, Hp, Zp, L),
        out_shape=jax.ShapeDtypeStruct((S * Bp, Zp), f32),
        in_specs=[vmem] * 6,
        out_specs=vmem,
        # NOTE: total VMEM footprint here is < 1 MiB, far under the scoped
        # default on v5e/v6e/v7x.  If shapes scale up, add a batch-parallel
        # grid + explicit vmem_limit_bytes (v7x has only 64 MiB VMEM, 2 TCs).
    )(x_p, wih, whh, b, fcw, fcb)
    return out_p.reshape(S, Bp, Zp)[:, :B, :Z]


def init_params(key, z_dim, hidden_dim, num_layers):
    """Deterministic init mimicking PyTorch: U(-1/sqrt(H), 1/sqrt(H))."""
    H, Z, L = hidden_dim, z_dim, num_layers
    k = 1.0 / jnp.sqrt(H)
    keys = jax.random.split(key, 6)
    # Stored pre-transposed so the kernel computes x @ W^T as x @ w_t.
    w_ih_t = jax.random.uniform(keys[0], (L, H, H), jnp.float32, -k, k)
    w_hh_t = jax.random.uniform(keys[1], (L, H, H), jnp.float32, -k, k)
    b_ih = jax.random.uniform(keys[2], (L, 1, H), jnp.float32, -k, k)
    b_hh = jax.random.uniform(keys[3], (L, 1, H), jnp.float32, -k, k)
    fc_w_t = jax.random.uniform(keys[4], (H, Z), jnp.float32, -k, k)
    fc_b = jax.random.uniform(keys[5], (1, Z), jnp.float32, -k, k)
    return dict(w_ih_t=w_ih_t, w_hh_t=w_hh_t, b_ih=b_ih, b_hh=b_hh,
                fc_w_t=fc_w_t, fc_b=fc_b)


def decoder_reference(x_enc, params):
    """Pure-JAX reference matching torch.nn.RNN(tanh) + Linear semantics."""
    S, B, H = x_enc.shape
    L = params["w_ih_t"].shape[0]
    seq = x_enc.astype(jnp.float32)
    for l in range(L):
        h = jnp.zeros((B, H), jnp.float32)
        outs = []
        for t in range(S):
            h = jnp.tanh(seq[t] @ params["w_ih_t"][l]
                         + h @ params["w_hh_t"][l]
                         + params["b_ih"][l] + params["b_hh"][l])
            outs.append(h)
        seq = jnp.stack(outs, axis=0)
    return seq @ params["fc_w_t"] + params["fc_b"]


if __name__ == "__main__":
    cfg = {"z_dim": 6, "hidden_dim": 12, "num_layers": 3}
    seq_len, batch = 8, 4

    key = jax.random.PRNGKey(0)
    k_x, k_p = jax.random.split(key)
    x_enc = jax.random.normal(k_x, (seq_len, batch, cfg["hidden_dim"]), jnp.float32)
    params = init_params(k_p, cfg["z_dim"], cfg["hidden_dim"], cfg["num_layers"])

    out = decoder_forward(x_enc, params)
    out = jax.block_until_ready(out)

    ref = decoder_reference(x_enc, params)
    assert out.shape == (seq_len, batch, cfg["z_dim"])
    assert jnp.allclose(out, ref, atol=1e-5, rtol=1e-5), "mismatch vs reference"

    print("KERNEL_OK")
</pallas_src>

<mosaic_0001>
module attributes {stable_mosaic.version = 11 : i64} {
  func.func @kernel(%arg0: memref<64x128xf32, #tpu.memory_space<vmem>>, %arg1: memref<3x128x128xf32, #tpu.memory_space<vmem>>, %arg2: memref<3x128x128xf32, #tpu.memory_space<vmem>>, %arg3: memref<3x1x128xf32, #tpu.memory_space<vmem>>, %arg4: memref<128x128xf32, #tpu.memory_space<vmem>>, %arg5: memref<1x128xf32, #tpu.memory_space<vmem>>, %arg6: memref<64x128xf32, #tpu.memory_space<vmem>>) attributes {dimension_semantics = [], scalar_prefetch = 0 : i64, scratch_operands = 0 : i64, tpu.core_type = #tpu.core_type<tc>} {
    %c0 = arith.constant 0 : index
    %c0_0 = arith.constant 0 : index
    %0 = vector.load %arg0[%c0, %c0_0] : memref<64x128xf32, #tpu.memory_space<vmem>>, vector<64x128xf32>
    %c0_1 = arith.constant 0 : index
    %c0_2 = arith.constant 0 : index
    %c0_3 = arith.constant 0 : index
    %1 = vector.load %arg1[%c0_1, %c0_2, %c0_3] : memref<3x128x128xf32, #tpu.memory_space<vmem>>, vector<1x128x128xf32>
    %2 = vector.shape_cast %1 : vector<1x128x128xf32> to vector<128x128xf32>
    %cst = arith.constant dense<0.000000e+00> : vector<64x128xf32>
    %3 = tpu.matmul %0, %2, %cst {dimension_numbers = #tpu.dot_dimension_numbers<[1], [0], [0], [1], [0, 0, 1, 1], [], []>} : vector<64x128xf32>, vector<128x128xf32>, vector<64x128xf32> -> vector<64x128xf32>
    %c0_4 = arith.constant 0 : index
    %c0_5 = arith.constant 0 : index
    %c0_6 = arith.constant 0 : index
    %4 = vector.load %arg3[%c0_4, %c0_5, %c0_6] : memref<3x1x128xf32, #tpu.memory_space<vmem>>, vector<1x1x128xf32>
    %5 = vector.shape_cast %4 : vector<1x1x128xf32> to vector<1x128xf32>
    %6 = vector.broadcast %5 : vector<1x128xf32> to vector<64x128xf32>
    %7 = arith.addf %3, %6 : vector<64x128xf32>
    %c0_7 = arith.constant 0 : index
    %c0_8 = arith.constant 0 : index
    %c0_9 = arith.constant 0 : index
    %8 = vector.load %arg2[%c0_7, %c0_8, %c0_9] : memref<3x128x128xf32, #tpu.memory_space<vmem>>, vector<1x128x128xf32>
    %9 = vector.shape_cast %8 : vector<1x128x128xf32> to vector<128x128xf32>
    %cst_10 = arith.constant 0.000000e+00 : f32
    %10 = vector.broadcast %cst_10 : f32 to vector<8x128xf32>
    %11 = vector.extract_strided_slice %7 {offsets = [0, 0], sizes = [8, 128], strides = [1, 1]} : vector<64x128xf32> to vector<8x128xf32>
    %cst_11 = arith.constant dense<0.000000e+00> : vector<8x128xf32>
    %12 = tpu.matmul %10, %9, %cst_11 {dimension_numbers = #tpu.dot_dimension_numbers<[1], [0], [0], [1], [0, 0, 1, 1], [], []>} : vector<8x128xf32>, vector<128x128xf32>, vector<8x128xf32> -> vector<8x128xf32>
    %13 = arith.addf %11, %12 : vector<8x128xf32>
    %14 = math.tanh %13 : vector<8x128xf32>
    %15 = vector.extract_strided_slice %7 {offsets = [8, 0], sizes = [8, 128], strides = [1, 1]} : vector<64x128xf32> to vector<8x128xf32>
    %cst_12 = arith.constant dense<0.000000e+00> : vector<8x128xf32>
    %16 = tpu.matmul %14, %9, %cst_12 {dimension_numbers = #tpu.dot_dimension_numbers<[1], [0], [0], [1], [0, 0, 1, 1], [], []>} : vector<8x128xf32>, vector<128x128xf32>, vector<8x128xf32> -> vector<8x128xf32>
    %17 = arith.addf %15, %16 : vector<8x128xf32>
    %18 = math.tanh %17 : vector<8x128xf32>
    %19 = vector.extract_strided_slice %7 {offsets = [16, 0], sizes = [8, 128], strides = [1, 1]} : vector<64x128xf32> to vector<8x128xf32>
    %cst_13 = arith.constant dense<0.000000e+00> : vector<8x128xf32>
    %20 = tpu.matmul %18, %9, %cst_13 {dimension_numbers = #tpu.dot_dimension_numbers<[1], [0], [0], [1], [0, 0, 1, 1], [], []>} : vector<8x128xf32>, vector<128x128xf32>, vector<8x128xf32> -> vector<8x128xf32>
    %21 = arith.addf %19, %20 : vector<8x128xf32>
    %22 = math.tanh %21 : vector<8x128xf32>
    %23 = vector.extract_strided_slice %7 {offsets = [24, 0], sizes = [8, 128], strides = [1, 1]} : vector<64x128xf32> to vector<8x128xf32>
    %cst_14 = arith.constant dense<0.000000e+00> : vector<8x128xf32>
    %24 = tpu.matmul %22, %9, %cst_14 {dimension_numbers = #tpu.dot_dimension_numbers<[1], [0], [0], [1], [0, 0, 1, 1], [], []>} : vector<8x128xf32>, vector<128x128xf32>, vector<8x128xf32> -> vector<8x128xf32>
    %25 = arith.addf %23, %24 : vector<8x128xf32>
    %26 = math.tanh %25 : vector<8x128xf32>
    %27 = vector.extract_strided_slice %7 {offsets = [32, 0], sizes = [8, 128], strides = [1, 1]} : vector<64x128xf32> to vector<8x128xf32>
    %cst_15 = arith.constant dense<0.000000e+00> : vector<8x128xf32>
    %28 = tpu.matmul %26, %9, %cst_15 {dimension_numbers = #tpu.dot_dimension_numbers<[1], [0], [0], [1], [0, 0, 1, 1], [], []>} : vector<8x128xf32>, vector<128x128xf32>, vector<8x128xf32> -> vector<8x128xf32>
    %29 = arith.addf %27, %28 : vector<8x128xf32>
    %30 = math.tanh %29 : vector<8x128xf32>
    %31 = vector.extract_strided_slice %7 {offsets = [40, 0], sizes = [8, 128], strides = [1, 1]} : vector<64x128xf32> to vector<8x128xf32>
    %cst_16 = arith.constant dense<0.000000e+00> : vector<8x128xf32>
    %32 = tpu.matmul %30, %9, %cst_16 {dimension_numbers = #tpu.dot_dimension_numbers<[1], [0], [0], [1], [0, 0, 1, 1], [], []>} : vector<8x128xf32>, vector<128x128xf32>, vector<8x128xf32> -> vector<8x128xf32>
    %33 = arith.addf %31, %32 : vector<8x128xf32>
    %34 = math.tanh %33 : vector<8x128xf32>
    %35 = vector.extract_strided_slice %7 {offsets = [48, 0], sizes = [8, 128], strides = [1, 1]} : vector<64x128xf32> to vector<8x128xf32>
    %cst_17 = arith.constant dense<0.000000e+00> : vector<8x128xf32>
    %36 = tpu.matmul %34, %9, %cst_17 {dimension_numbers = #tpu.dot_dimension_numbers<[1], [0], [0], [1], [0, 0, 1, 1], [], []>} : vector<8x128xf32>, vector<128x128xf32>, vector<8x128xf32> -> vector<8x128xf32>
    %37 = arith.addf %35, %36 : vector<8x128xf32>
    %38 = math.tanh %37 : vector<8x128xf32>
    %39 = vector.extract_strided_slice %7 {offsets = [56, 0], sizes = [8, 128], strides = [1, 1]} : vector<64x128xf32> to vector<8x128xf32>
    %cst_18 = arith.constant dense<0.000000e+00> : vector<8x128xf32>
    %40 = tpu.matmul %38, %9, %cst_18 {dimension_numbers = #tpu.dot_dimension_numbers<[1], [0], [0], [1], [0, 0, 1, 1], [], []>} : vector<8x128xf32>, vector<128x128xf32>, vector<8x128xf32> -> vector<8x128xf32>
    %41 = arith.addf %39, %40 : vector<8x128xf32>
    %42 = math.tanh %41 : vector<8x128xf32>
    %43 = tpu.concatenate %14, %18, %22, %26, %30, %34, %38, %42 in 0 : vector<8x128xf32>, vector<8x128xf32>, vector<8x128xf32>, vector<8x128xf32>, vector<8x128xf32>, vector<8x128xf32>, vector<8x128xf32>, vector<8x128xf32> -> vector<64x128xf32>
    %c1 = arith.constant 1 : index
    %c0_19 = arith.constant 0 : index
    %c0_20 = arith.constant 0 : index
    %44 = vector.load %arg1[%c1, %c0_19, %c0_20] : memref<3x128x128xf32, #tpu.memory_space<vmem>>, vector<1x128x128xf32>
    %45 = vector.shape_cast %44 : vector<1x128x128xf32> to vector<128x128xf32>
    %cst_21 = arith.constant dense<0.000000e+00> : vector<64x128xf32>
    %46 = tpu.matmul %43, %45, %cst_21 {dimension_numbers = #tpu.dot_dimension_numbers<[1], [0], [0], [1], [0, 0, 1, 1], [], []>} : vector<64x128xf32>, vector<128x128xf32>, vector<64x128xf32> -> vector<64x128xf32>
    %c1_22 = arith.constant 1 : index
    %c0_23 = arith.constant 0 : index
    %c0_24 = arith.constant 0 : index
    %47 = vector.load %arg3[%c1_22, %c0_23, %c0_24] : memref<3x1x128xf32, #tpu.memory_space<vmem>>, vector<1x1x128xf32>
    %48 = vector.shape_cast %47 : vector<1x1x128xf32> to vector<1x128xf32>
    %49 = vector.broadcast %48 : vector<1x128xf32> to vector<64x128xf32>
    %50 = arith.addf %46, %49 : vector<64x128xf32>
    %c1_25 = arith.constant 1 : index
    %c0_26 = arith.constant 0 : index
    %c0_27 = arith.constant 0 : index
    %51 = vector.load %arg2[%c1_25, %c0_26, %c0_27] : memref<3x128x128xf32, #tpu.memory_space<vmem>>, vector<1x128x128xf32>
    %52 = vector.shape_cast %51 : vector<1x128x128xf32> to vector<128x128xf32>
    %cst_28 = arith.constant 0.000000e+00 : f32
    %53 = vector.broadcast %cst_28 : f32 to vector<8x128xf32>
    %54 = vector.extract_strided_slice %50 {offsets = [0, 0], sizes = [8, 128], strides = [1, 1]} : vector<64x128xf32> to vector<8x128xf32>
    %cst_29 = arith.constant dense<0.000000e+00> : vector<8x128xf32>
    %55 = tpu.matmul %53, %52, %cst_29 {dimension_numbers = #tpu.dot_dimension_numbers<[1], [0], [0], [1], [0, 0, 1, 1], [], []>} : vector<8x128xf32>, vector<128x128xf32>, vector<8x128xf32> -> vector<8x128xf32>
    %56 = arith.addf %54, %55 : vector<8x128xf32>
    %57 = math.tanh %56 : vector<8x128xf32>
    %58 = vector.extract_strided_slice %50 {offsets = [8, 0], sizes = [8, 128], strides = [1, 1]} : vector<64x128xf32> to vector<8x128xf32>
    %cst_30 = arith.constant dense<0.000000e+00> : vector<8x128xf32>
    %59 = tpu.matmul %57, %52, %cst_30 {dimension_numbers = #tpu.dot_dimension_numbers<[1], [0], [0], [1], [0, 0, 1, 1], [], []>} : vector<8x128xf32>, vector<128x128xf32>, vector<8x128xf32> -> vector<8x128xf32>
    %60 = arith.addf %58, %59 : vector<8x128xf32>
    %61 = math.tanh %60 : vector<8x128xf32>
    %62 = vector.extract_strided_slice %50 {offsets = [16, 0], sizes = [8, 128], strides = [1, 1]} : vector<64x128xf32> to vector<8x128xf32>
    %cst_31 = arith.constant dense<0.000000e+00> : vector<8x128xf32>
    %63 = tpu.matmul %61, %52, %cst_31 {dimension_numbers = #tpu.dot_dimension_numbers<[1], [0], [0], [1], [0, 0, 1, 1], [], []>} : vector<8x128xf32>, vector<128x128xf32>, vector<8x128xf32> -> vector<8x128xf32>
    %64 = arith.addf %62, %63 : vector<8x128xf32>
    %65 = math.tanh %64 : vector<8x128xf32>
    %66 = vector.extract_strided_slice %50 {offsets = [24, 0], sizes = [8, 128], strides = [1, 1]} : vector<64x128xf32> to vector<8x128xf32>
    %cst_32 = arith.constant dense<0.000000e+00> : vector<8x128xf32>
    %67 = tpu.matmul %65, %52, %cst_32 {dimension_numbers = #tpu.dot_dimension_numbers<[1], [0], [0], [1], [0, 0, 1, 1], [], []>} : vector<8x128xf32>, vector<128x128xf32>, vector<8x128xf32> -> vector<8x128xf32>
    %68 = arith.addf %66, %67 : vector<8x128xf32>
    %69 = math.tanh %68 : vector<8x128xf32>
    %70 = vector.extract_strided_slice %50 {offsets = [32, 0], sizes = [8, 128], strides = [1, 1]} : vector<64x128xf32> to vector<8x128xf32>
    %cst_33 = arith.constant dense<0.000000e+00> : vector<8x128xf32>
    %71 = tpu.matmul %69, %52, %cst_33 {dimension_numbers = #tpu.dot_dimension_numbers<[1], [0], [0], [1], [0, 0, 1, 1], [], []>} : vector<8x128xf32>, vector<128x128xf32>, vector<8x128xf32> -> vector<8x128xf32>
    %72 = arith.addf %70, %71 : vector<8x128xf32>
    %73 = math.tanh %72 : vector<8x128xf32>
    %74 = vector.extract_strided_slice %50 {offsets = [40, 0], sizes = [8, 128], strides = [1, 1]} : vector<64x128xf32> to vector<8x128xf32>
    %cst_34 = arith.constant dense<0.000000e+00> : vector<8x128xf32>
    %75 = tpu.matmul %73, %52, %cst_34 {dimension_numbers = #tpu.dot_dimension_numbers<[1], [0], [0], [1], [0, 0, 1, 1], [], []>} : vector<8x128xf32>, vector<128x128xf32>, vector<8x128xf32> -> vector<8x128xf32>
    %76 = arith.addf %74, %75 : vector<8x128xf32>
    %77 = math.tanh %76 : vector<8x128xf32>
    %78 = vector.extract_strided_slice %50 {offsets = [48, 0], sizes = [8, 128], strides = [1, 1]} : vector<64x128xf32> to vector<8x128xf32>
    %cst_35 = arith.constant dense<0.000000e+00> : vector<8x128xf32>
    %79 = tpu.matmul %77, %52, %cst_35 {dimension_numbers = #tpu.dot_dimension_numbers<[1], [0], [0], [1], [0, 0, 1, 1], [], []>} : vector<8x128xf32>, vector<128x128xf32>, vector<8x128xf32> -> vector<8x128xf32>
    %80 = arith.addf %78, %79 : vector<8x128xf32>
    %81 = math.tanh %80 : vector<8x128xf32>
    %82 = vector.extract_strided_slice %50 {offsets = [56, 0], sizes = [8, 128], strides = [1, 1]} : vector<64x128xf32> to vector<8x128xf32>
    %cst_36 = arith.constant dense<0.000000e+00> : vector<8x128xf32>
    %83 = tpu.matmul %81, %52, %cst_36 {dimension_numbers = #tpu.dot_dimension_numbers<[1], [0], [0], [1], [0, 0, 1, 1], [], []>} : vector<8x128xf32>, vector<128x128xf32>, vector<8x128xf32> -> vector<8x128xf32>
    %84 = arith.addf %82, %83 : vector<8x128xf32>
    %85 = math.tanh %84 : vector<8x128xf32>
    %86 = tpu.concatenate %57, %61, %65, %69, %73, %77, %81, %85 in 0 : vector<8x128xf32>, vector<8x128xf32>, vector<8x128xf32>, vector<8x128xf32>, vector<8x128xf32>, vector<8x128xf32>, vector<8x128xf32>, vector<8x128xf32> -> vector<64x128xf32>
    %c2 = arith.constant 2 : index
    %c0_37 = arith.constant 0 : index
    %c0_38 = arith.constant 0 : index
    %87 = vector.load %arg1[%c2, %c0_37, %c0_38] : memref<3x128x128xf32, #tpu.memory_space<vmem>>, vector<1x128x128xf32>
    %88 = vector.shape_cast %87 : vector<1x128x128xf32> to vector<128x128xf32>
    %cst_39 = arith.constant dense<0.000000e+00> : vector<64x128xf32>
    %89 = tpu.matmul %86, %88, %cst_39 {dimension_numbers = #tpu.dot_dimension_numbers<[1], [0], [0], [1], [0, 0, 1, 1], [], []>} : vector<64x128xf32>, vector<128x128xf32>, vector<64x128xf32> -> vector<64x128xf32>
    %c2_40 = arith.constant 2 : index
    %c0_41 = arith.constant 0 : index
    %c0_42 = arith.constant 0 : index
    %90 = vector.load %arg3[%c2_40, %c0_41, %c0_42] : memref<3x1x128xf32, #tpu.memory_space<vmem>>, vector<1x1x128xf32>
    %91 = vector.shape_cast %90 : vector<1x1x128xf32> to vector<1x128xf32>
    %92 = vector.broadcast %91 : vector<1x128xf32> to vector<64x128xf32>
    %93 = arith.addf %89, %92 : vector<64x128xf32>
    %c2_43 = arith.constant 2 : index
    %c0_44 = arith.constant 0 : index
    %c0_45 = arith.constant 0 : index
    %94 = vector.load %arg2[%c2_43, %c0_44, %c0_45] : memref<3x128x128xf32, #tpu.memory_space<vmem>>, vector<1x128x128xf32>
    %95 = vector.shape_cast %94 : vector<1x128x128xf32> to vector<128x128xf32>
    %cst_46 = arith.constant 0.000000e+00 : f32
    %96 = vector.broadcast %cst_46 : f32 to vector<8x128xf32>
    %97 = vector.extract_strided_slice %93 {offsets = [0, 0], sizes = [8, 128], strides = [1, 1]} : vector<64x128xf32> to vector<8x128xf32>
    %cst_47 = arith.constant dense<0.000000e+00> : vector<8x128xf32>
    %98 = tpu.matmul %96, %95, %cst_47 {dimension_numbers = #tpu.dot_dimension_numbers<[1], [0], [0], [1], [0, 0, 1, 1], [], []>} : vector<8x128xf32>, vector<128x128xf32>, vector<8x128xf32> -> vector<8x128xf32>
    %99 = arith.addf %97, %98 : vector<8x128xf32>
    %100 = math.tanh %99 : vector<8x128xf32>
    %101 = vector.extract_strided_slice %93 {offsets = [8, 0], sizes = [8, 128], strides = [1, 1]} : vector<64x128xf32> to vector<8x128xf32>
    %cst_48 = arith.constant dense<0.000000e+00> : vector<8x128xf32>
    %102 = tpu.matmul %100, %95, %cst_48 {dimension_numbers = #tpu.dot_dimension_numbers<[1], [0], [0], [1], [0, 0, 1, 1], [], []>} : vector<8x128xf32>, vector<128x128xf32>, vector<8x128xf32> -> vector<8x128xf32>
    %103 = arith.addf %101, %102 : vector<8x128xf32>
    %104 = math.tanh %103 : vector<8x128xf32>
    %105 = vector.extract_strided_slice %93 {offsets = [16, 0], sizes = [8, 128], strides = [1, 1]} : vector<64x128xf32> to vector<8x128xf32>
    %cst_49 = arith.constant dense<0.000000e+00> : vector<8x128xf32>
    %106 = tpu.matmul %104, %95, %cst_49 {dimension_numbers = #tpu.dot_dimension_numbers<[1], [0], [0], [1], [0, 0, 1, 1], [], []>} : vector<8x128xf32>, vector<128x128xf32>, vector<8x128xf32> -> vector<8x128xf32>
    %107 = arith.addf %105, %106 : vector<8x128xf32>
    %108 = math.tanh %107 : vector<8x128xf32>
    %109 = vector.extract_strided_slice %93 {offsets = [24, 0], sizes = [8, 128], strides = [1, 1]} : vector<64x128xf32> to vector<8x128xf32>
    %cst_50 = arith.constant dense<0.000000e+00> : vector<8x128xf32>
    %110 = tpu.matmul %108, %95, %cst_50 {dimension_numbers = #tpu.dot_dimension_numbers<[1], [0], [0], [1], [0, 0, 1, 1], [], []>} : vector<8x128xf32>, vector<128x128xf32>, vector<8x128xf32> -> vector<8x128xf32>
    %111 = arith.addf %109, %110 : vector<8x128xf32>
    %112 = math.tanh %111 : vector<8x128xf32>
    %113 = vector.extract_strided_slice %93 {offsets = [32, 0], sizes = [8, 128], strides = [1, 1]} : vector<64x128xf32> to vector<8x128xf32>
    %cst_51 = arith.constant dense<0.000000e+00> : vector<8x128xf32>
    %114 = tpu.matmul %112, %95, %cst_51 {dimension_numbers = #tpu.dot_dimension_numbers<[1], [0], [0], [1], [0, 0, 1, 1], [], []>} : vector<8x128xf32>, vector<128x128xf32>, vector<8x128xf32> -> vector<8x128xf32>
    %115 = arith.addf %113, %114 : vector<8x128xf32>
    %116 = math.tanh %115 : vector<8x128xf32>
    %117 = vector.extract_strided_slice %93 {offsets = [40, 0], sizes = [8, 128], strides = [1, 1]} : vector<64x128xf32> to vector<8x128xf32>
    %cst_52 = arith.constant dense<0.000000e+00> : vector<8x128xf32>
    %118 = tpu.matmul %116, %95, %cst_52 {dimension_numbers = #tpu.dot_dimension_numbers<[1], [0], [0], [1], [0, 0, 1, 1], [], []>} : vector<8x128xf32>, vector<128x128xf32>, vector<8x128xf32> -> vector<8x128xf32>
    %119 = arith.addf %117, %118 : vector<8x128xf32>
    %120 = math.tanh %119 : vector<8x128xf32>
    %121 = vector.extract_strided_slice %93 {offsets = [48, 0], sizes = [8, 128], strides = [1, 1]} : vector<64x128xf32> to vector<8x128xf32>
    %cst_53 = arith.constant dense<0.000000e+00> : vector<8x128xf32>
    %122 = tpu.matmul %120, %95, %cst_53 {dimension_numbers = #tpu.dot_dimension_numbers<[1], [0], [0], [1], [0, 0, 1, 1], [], []>} : vector<8x128xf32>, vector<128x128xf32>, vector<8x128xf32> -> vector<8x128xf32>
    %123 = arith.addf %121, %122 : vector<8x128xf32>
    %124 = math.tanh %123 : vector<8x128xf32>
    %125 = vector.extract_strided_slice %93 {offsets = [56, 0], sizes = [8, 128], strides = [1, 1]} : vector<64x128xf32> to vector<8x128xf32>
    %cst_54 = arith.constant dense<0.000000e+00> : vector<8x128xf32>
    %126 = tpu.matmul %124, %95, %cst_54 {dimension_numbers = #tpu.dot_dimension_numbers<[1], [0], [0], [1], [0, 0, 1, 1], [], []>} : vector<8x128xf32>, vector<128x128xf32>, vector<8x128xf32> -> vector<8x128xf32>
    %127 = arith.addf %125, %126 : vector<8x128xf32>
    %128 = math.tanh %127 : vector<8x128xf32>
    %129 = tpu.concatenate %100, %104, %108, %112, %116, %120, %124, %128 in 0 : vector<8x128xf32>, vector<8x128xf32>, vector<8x128xf32>, vector<8x128xf32>, vector<8x128xf32>, vector<8x128xf32>, vector<8x128xf32>, vector<8x128xf32> -> vector<64x128xf32>
    %c0_55 = arith.constant 0 : index
    %c0_56 = arith.constant 0 : index
    %130 = vector.load %arg4[%c0_55, %c0_56] : memref<128x128xf32, #tpu.memory_space<vmem>>, vector<128x128xf32>
    %cst_57 = arith.constant dense<0.000000e+00> : vector<64x128xf32>
    %131 = tpu.matmul %129, %130, %cst_57 {dimension_numbers = #tpu.dot_dimension_numbers<[1], [0], [0], [1], [0, 0, 1, 1], [], []>} : vector<64x128xf32>, vector<128x128xf32>, vector<64x128xf32> -> vector<64x128xf32>
    %c0_58 = arith.constant 0 : index
    %c0_59 = arith.constant 0 : index
    %132 = vector.load %arg5[%c0_58, %c0_59] : memref<1x128xf32, #tpu.memory_space<vmem>>, vector<1x128xf32>
    %133 = vector.broadcast %132 : vector<1x128xf32> to vector<64x128xf32>
    %134 = arith.addf %131, %133 : vector<64x128xf32>
    %c0_60 = arith.constant 0 : index
    %c0_61 = arith.constant 0 : index
    %135 = vector.load %arg6[%c0_60, %c0_61] : memref<64x128xf32, #tpu.memory_space<vmem>>, vector<64x128xf32>
    tpu.vector_store %arg6[%c0_60, %c0_61], %134 {strides = array<i32>} : memref<64x128xf32, #tpu.memory_space<vmem>>, vector<64x128xf32>,
    return
  }
}

</mosaic_0001>

<bundles_post_ra>
// kernel: decoder_forward.1
= control target key start
LH: loop header
LB: loop body
LE: loop exit
PB: predicated region body
PF: predicated region fallthrough
CT: control target
= control target key end

     0   :  { %v3977_v2 = vmov 0.0   ;;  %vm3978_vm0 = vmmov 0   ;;  %s5460_s1 = inlined_call_operand.vmem [shape: f32[3,128,128], index: 1, kind: input, shape index: {}]   ;;  %s5461_s2 = inlined_call_operand.vmem [shape: f32[3,128,128], index: 2, kind: input, shape index: {}]   ;;  %s5462_s0 = inlined_call_operand.vmem [shape: f32[64,128], index: 0, kind: input, shape index: {}]   ;;  %s5463_s3 = inlined_call_operand.vmem [shape: f32[3,1,128], index: 3, kind: input, shape index: {}]   ;;  %s5464_s4 = inlined_call_operand.vmem [shape: f32[128,128], index: 4, kind: input, shape index: {}]   ;;  %s5465_s5 = inlined_call_operand.vmem [shape: f32[1,128], index: 5, kind: input, shape index: {}]   ;;  %s5466_s6 = inlined_call_operand.vmem [shape: f32[64,128], index: 6, kind: output, shape index: {}]  }
   0x1   :  { %v46_v0 = vld [vmem:[%s5460_s1 + $0x78] sm:$0xff]  ;;  %v45_v1 = vld [vmem:[%s5460_s1 + $0x70] sm:$0xff]  ;;  %2955 = vmatprep.subr.mxu1 %v3977_v2  ;;  %2987 = vmatprep.mubr.msk.f32.mxu1 %vm3978_vm0, %v3977_v2  ;;  %v44_v5 = vld [vmem:[%s5460_s1 + $0x68] sm:$0xff] }
   0x2   :  { %v4024_v3 = vld [vmem:[%s5461_s2 + $0x78] sm:$0xff]  ;;  %2911 = vmatprep.subr.mxu0 %v46_v0  ;;  %v4032_v4 = vld [vmem:[%s5461_s2 + $0x70] sm:$0xff]  ;;  %v4041_v6 = vld [vmem:[%s5461_s2 + $0x68] sm:$0xff] }
   0x3   :  { %2956 = vmatpush3.msra.mxu1 %v4024_v3  ;;  %2912 = vmatpush3.msra.mxu0 %v46_v0  ;;  %v43_v7 = vld [vmem:[%s5460_s1 + $0x60] sm:$0xff]  ;;  %v42_v9 = vld [vmem:[%s5460_s1 + $0x58] sm:$0xff]  ;;  %v41_v11 = vld [vmem:[%s5460_s1 + $0x50] sm:$0xff] }
   0x4   :  { %2957 = vmatprep.subr.mxu1 %v3977_v2  ;;  %2913 = vmatprep.subr.mxu0 %v45_v1  ;;  %v4051_v8 = vld [vmem:[%s5461_s2 + $0x60] sm:$0xff]  ;;  %v4061_v10 = vld [vmem:[%s5461_s2 + $0x58] sm:$0xff]  ;;  %v4071_v12 = vld [vmem:[%s5461_s2 + $0x50] sm:$0xff] }
   0x5   :  { %2958 = vmatpush3.msra.mxu1 %v4032_v4  ;;  %2914 = vmatpush3.msra.mxu0 %v45_v1  ;;  %v40_v13 = vld [vmem:[%s5460_s1 + $0x48] sm:$0xff]  ;;  %v39_v15 = vld [vmem:[%s5460_s1 + $0x40] sm:$0xff]  ;;  %v38_v17 = vld [vmem:[%s5460_s1 + $0x38] sm:$0xff] }
   0x6   :  { %2959 = vmatprep.subr.mxu1 %v3977_v2  ;;  %2915 = vmatprep.subr.mxu0 %v44_v5  ;;  %v4081_v14 = vld [vmem:[%s5461_s2 + $0x48] sm:$0xff]  ;;  %v4091_v16 = vld [vmem:[%s5461_s2 + $0x40] sm:$0xff]  ;;  %v4101_v18 = vld [vmem:[%s5461_s2 + $0x38] sm:$0xff] }
   0x7   :  { %2960 = vmatpush3.msra.mxu1 %v4041_v6  ;;  %2916 = vmatpush3.msra.mxu0 %v44_v5  ;;  %v37_v19 = vld [vmem:[%s5460_s1 + $0x30] sm:$0xff]  ;;  %v36_v21 = vld [vmem:[%s5460_s1 + $0x28] sm:$0xff]  ;;  %v35_v23 = vld [vmem:[%s5460_s1 + $0x20] sm:$0xff] }
   0x8   :  { %2961 = vmatprep.subr.mxu1 %v3977_v2  ;;  %2917 = vmatprep.subr.mxu0 %v43_v7  ;;  %v4111_v20 = vld [vmem:[%s5461_s2 + $0x30] sm:$0xff]  ;;  %v4121_v22 = vld [vmem:[%s5461_s2 + $0x28] sm:$0xff]  ;;  %v4131_v24 = vld [vmem:[%s5461_s2 + $0x20] sm:$0xff] }
   0x9   :  { %2962 = vmatpush3.msra.mxu1 %v4051_v8  ;;  %2918 = vmatpush3.msra.mxu0 %v43_v7  ;;  %v34_v25 = vld [vmem:[%s5460_s1 + $0x18] sm:$0xff]  ;;  %v33_v27 = vld [vmem:[%s5460_s1 + $0x10] sm:$0xff]  ;;  %v32_v29 = vld [vmem:[%s5460_s1 + $0x8] sm:$0xff] }
   0xa   :  { %2963 = vmatprep.subr.mxu1 %v3977_v2  ;;  %2919 = vmatprep.subr.mxu0 %v42_v9  ;;  %v4141_v26 = vld [vmem:[%s5461_s2 + $0x18] sm:$0xff]  ;;  %v4151_v28 = vld [vmem:[%s5461_s2 + $0x10] sm:$0xff]  ;;  %v23_v30 = vld [vmem:[%s5462_s0] sm:$0xff] }
   0xb   :  { %2964 = vmatpush3.msra.mxu1 %v4061_v10  ;;  %2920 = vmatpush3.msra.mxu0 %v42_v9  ;;  %v4165_v31 = vld [vmem:[%s5461_s2 + $0x8] sm:$0xff]  ;;  %v31_v32 = vld [vmem:[%s5460_s1] sm:$0xff]  ;;  %v25_v35 = vld [vmem:[%s5462_s0 + $0x10] sm:$0xff] }
   0xc   :  { %2965 = vmatprep.subr.mxu1 %v3977_v2  ;;  %2921 = vmatprep.subr.mxu0 %v41_v11  ;;  %v4174_v33 = vld [vmem:[%s5461_s2] sm:$0xff]  ;;  %v24_v34 = vld [vmem:[%s5462_s0 + $0x8] sm:$0xff]  ;;  %v26_v36 = vld [vmem:[%s5462_s0 + $0x18] sm:$0xff] }
   0xd   :  { %2966 = vmatpush3.msra.mxu1 %v4071_v12  ;;  %2922 = vmatpush3.msra.mxu0 %v41_v11  ;;  %v27_v37 = vld [vmem:[%s5462_s0 + $0x20] sm:$0xff]  ;;  %v28_v38 = vld [vmem:[%s5462_s0 + $0x28] sm:$0xff]  ;;  %v29_v39 = vld [vmem:[%s5462_s0 + $0x30] sm:$0xff] }
   0xe   :  { %2967 = vmatprep.subr.mxu1 %v3977_v2  ;;  %2923 = vmatprep.subr.mxu0 %v40_v13  ;;  %v30_v40 = vld [vmem:[%s5462_s0 + $0x38] sm:$0xff]  ;;  %v4274_v43 = vld [vmem:[%s5463_s3] ss:$0 sm:$0xff] }
   0xf   :  { %2968 = vmatpush3.msra.mxu1 %v4081_v14  ;;  %2924 = vmatpush3.msra.mxu0 %v40_v13 }
  0x10   :  { %2969 = vmatprep.subr.mxu1 %v3977_v2  ;;  %2925 = vmatprep.subr.mxu0 %v39_v15 }
  0x11   :  { %2970 = vmatpush3.msra.mxu1 %v4091_v16  ;;  %2926 = vmatpush3.msra.mxu0 %v39_v15 }
  0x12   :  { %2971 = vmatprep.subr.mxu1 %v3977_v2  ;;  %2927 = vmatprep.subr.mxu0 %v38_v17 }
  0x13   :  { %2972 = vmatpush3.msra.mxu1 %v4101_v18  ;;  %2928 = vmatpush3.msra.mxu0 %v38_v17 }
  0x14   :  { %2973 = vmatprep.subr.mxu1 %v3977_v2  ;;  %2929 = vmatprep.subr.mxu0 %v37_v19 }
  0x15   :  { %2974 = vmatpush3.msra.mxu1 %v4111_v20  ;;  %2930 = vmatpush3.msra.mxu0 %v37_v19 }
  0x16   :  { %2975 = vmatprep.subr.mxu1 %v3977_v2  ;;  %2931 = vmatprep.subr.mxu0 %v36_v21 }
  0x17   :  { %2976 = vmatpush3.msra.mxu1 %v4121_v22  ;;  %2932 = vmatpush3.msra.mxu0 %v36_v21 }
  0x18   :  { %2977 = vmatprep.subr.mxu1 %v3977_v2  ;;  %2933 = vmatprep.subr.mxu0 %v35_v23 }
  0x19   :  { %2978 = vmatpush3.msra.mxu1 %v4131_v24  ;;  %2934 = vmatpush3.msra.mxu0 %v35_v23  ;;  %v2347_v23 = vld [vmem:[%s5460_s1 + $0xc8] sm:$0xff] }
  0x1a   :  { %2979 = vmatprep.subr.mxu1 %v3977_v2  ;;  %2935 = vmatprep.subr.mxu0 %v34_v25 }
  0x1b   :  { %2980 = vmatpush3.msra.mxu1 %v4141_v26  ;;  %2936 = vmatpush3.msra.mxu0 %v34_v25  ;;  %v2345_v25 = vld [vmem:[%s5460_s1 + $0xb8] sm:$0xff] }
  0x1c   :  { %2981 = vmatprep.subr.mxu1 %v3977_v2  ;;  %2937 = vmatprep.subr.mxu0 %v33_v27 }
  0x1d   :  { %2982 = vmatpush3.msra.mxu1 %v4151_v28  ;;  %2938 = vmatpush3.msra.mxu0 %v33_v27  ;;  %v2343_v27 = vld [vmem:[%s5460_s1 + $0xa8] sm:$0xff] }
  0x1e   :  { %2983 = vmatprep.subr.mxu1 %v3977_v2  ;;  %2939 = vmatprep.subr.mxu0 %v32_v29 }
  0x1f   :  { %2943 = vmatprep.mubr.f32.mxu0 %v23_v30  ;;  %2940 = vmatpush3.msra.mxu0 %v32_v29  ;;  %v2341_v29 = vld [vmem:[%s5460_s1 + $0x98] sm:$0xff]  ;;  %v2340_v30 = vld [vmem:[%s5460_s1 + $0x90] sm:$0xff] }
  0x20   :  { %2984 = vmatpush3.msra.mxu1 %v4165_v31  ;;  %2941 = vmatprep.subr.mxu0 %v31_v32 }
  0x21   :  { %2985 = vmatprep.subr.mxu1 %v3977_v2  ;;  %2942 = vmatpush3.msra.mxu0 %v31_v32  ;;  %v2338_v32 = vld [vmem:[%s5460_s1 + $0x80] sm:$0xff] }
  0x22   :  { %2986 = vmatpush3.msra.mxu1 %v4174_v33  ;;  %2944 = vmatmul.mubr.f32.vlgmr.msra.gmra.mxu0 %v24_v34  ;;  %v4542_v34 = vld [vmem:[%s5461_s2 + $0xf0] sm:$0xff] }
  0x23   :  { %2988 = vmatmul.mubr.f32.vlgmr.msra.gmra.mxu1 %v3977_v2  ;;  %2990 = vmatprep.subr.mxu0 %v3977_v2 }
  0x24   :  { %3025 = vmatprep.subr.mxu1 %v3977_v2  ;;  %2991 = vmatpush3.msra.mxu0 %v4024_v3 }
  0x25   :  { %3026 = vmatpush3.msra.mxu1 %v4024_v3  ;;  %2992 = vmatprep.subr.mxu0 %v3977_v2 }
  0x26   :  { %3027 = vmatprep.subr.mxu1 %v3977_v2  ;;  %2993 = vmatpush3.msra.mxu0 %v4032_v4 }
  0x27   :  { %3028 = vmatpush3.msra.mxu1 %v4032_v4  ;;  %2994 = vmatprep.subr.mxu0 %v3977_v2 }
  0x28   :  { %3029 = vmatprep.subr.mxu1 %v3977_v2  ;;  %2995 = vmatpush3.msra.mxu0 %v4041_v6 }
  0x29   :  { %3030 = vmatpush3.msra.mxu1 %v4041_v6  ;;  %2996 = vmatprep.subr.mxu0 %v3977_v2 }
  0x2a   :  { %3031 = vmatprep.subr.mxu1 %v3977_v2  ;;  %2997 = vmatpush3.msra.mxu0 %v4051_v8 }
  0x2b   :  { %3032 = vmatpush3.msra.mxu1 %v4051_v8  ;;  %2998 = vmatprep.subr.mxu0 %v3977_v2 }
  0x2c   :  { %3033 = vmatprep.subr.mxu1 %v3977_v2  ;;  %2999 = vmatpush3.msra.mxu0 %v4061_v10 }
  0x2d   :  { %3034 = vmatpush3.msra.mxu1 %v4061_v10  ;;  %3000 = vmatprep.subr.mxu0 %v3977_v2 }
  0x2e   :  { %3035 = vmatprep.subr.mxu1 %v3977_v2  ;;  %3001 = vmatpush3.msra.mxu0 %v4071_v12 }
  0x2f   :  { %3036 = vmatpush3.msra.mxu1 %v4071_v12  ;;  %3002 = vmatprep.subr.mxu0 %v3977_v2 }
  0x30   :  { %3037 = vmatprep.subr.mxu1 %v3977_v2  ;;  %3003 = vmatpush3.msra.mxu0 %v4081_v14 }
  0x31   :  { %3038 = vmatpush3.msra.mxu1 %v4081_v14  ;;  %3004 = vmatprep.subr.mxu0 %v3977_v2 }
  0x32   :  { %3039 = vmatprep.subr.mxu1 %v3977_v2  ;;  %3005 = vmatpush3.msra.mxu0 %v4091_v16 }
  0x33   :  { %3040 = vmatpush3.msra.mxu1 %v4091_v16  ;;  %3006 = vmatprep.subr.mxu0 %v3977_v2 }
  0x34   :  { %3041 = vmatprep.subr.mxu1 %v3977_v2  ;;  %3007 = vmatpush3.msra.mxu0 %v4101_v18 }
  0x35   :  { %3042 = vmatpush3.msra.mxu1 %v4101_v18  ;;  %3008 = vmatprep.subr.mxu0 %v3977_v2 }
  0x36   :  { %3043 = vmatprep.subr.mxu1 %v3977_v2  ;;  %3009 = vmatpush3.msra.mxu0 %v4111_v20 }
  0x37   :  { %3044 = vmatpush3.msra.mxu1 %v4111_v20  ;;  %3010 = vmatprep.subr.mxu0 %v3977_v2 }
  0x38   :  { %3045 = vmatprep.subr.mxu1 %v3977_v2  ;;  %3011 = vmatpush3.msra.mxu0 %v4121_v22 }
  0x39   :  { %3046 = vmatpush3.msra.mxu1 %v4121_v22  ;;  %3012 = vmatprep.subr.mxu0 %v3977_v2 }
  0x3a   :  { %3047 = vmatprep.subr.mxu1 %v3977_v2  ;;  %3013 = vmatpush3.msra.mxu0 %v4131_v24 }
  0x3b   :  { %3048 = vmatpush3.msra.mxu1 %v4131_v24  ;;  %3014 = vmatprep.subr.mxu0 %v3977_v2 }
  0x3c   :  { %3049 = vmatprep.subr.mxu1 %v3977_v2  ;;  %3015 = vmatpush3.msra.mxu0 %v4141_v26 }
  0x3d   :  { %3050 = vmatpush3.msra.mxu1 %v4141_v26  ;;  %3016 = vmatprep.subr.mxu0 %v3977_v2 }
  0x3e   :  { %3051 = vmatprep.subr.mxu1 %v3977_v2  ;;  %3017 = vmatpush3.msra.mxu0 %v4151_v28 }
  0x3f   :  { %3052 = vmatpush3.msra.mxu1 %v4151_v28  ;;  %3018 = vmatprep.subr.mxu0 %v3977_v2 }
  0x40   :  { %3053 = vmatprep.subr.mxu1 %v3977_v2  ;;  %3019 = vmatpush3.msra.mxu0 %v4165_v31 }
  0x41   :  { %3054 = vmatpush3.msra.mxu1 %v4165_v31  ;;  %3020 = vmatprep.subr.mxu0 %v3977_v2 }
  0x42   :  { %3055 = vmatprep.subr.mxu1 %v3977_v2  ;;  %3021 = vmatpush3.msra.mxu0 %v4174_v33 }
  0x43   :  { %3056 = vmatpush3.msra.mxu1 %v4174_v33  ;;  %3057 = vmatprep.mubr.msk.f32.mxu1 %vm3978_vm0, %v3977_v2 }
  0x44   :  { %3060 = vmatprep.subr.mxu0 %v3977_v2  ;;  %3095 = vmatprep.subr.mxu1 %v3977_v2 }
  0x45   :  { %2946 = vmatprep.mubr.f32.mxu0 %v25_v35  ;;  %v4549_v35 = vld [vmem:[%s5461_s2 + $0xe8] sm:$0xff] }
  0x46   :  { %2947 = vmatmul.mubr.f32.gmra.mxu0 %v26_v36  ;;  %v4556_v36 = vld [vmem:[%s5461_s2 + $0xe0] sm:$0xff] }
  0x47   :  { %2949 = vmatprep.mubr.f32.mxu0 %v27_v37  ;;  %v4563_v37 = vld [vmem:[%s5461_s2 + $0xd8] sm:$0xff] }
  0x4a   :  { %2950 = vmatmul.mubr.f32.gmra.mxu0 %v28_v38  ;;  %v4570_v38 = vld [vmem:[%s5461_s2 + $0xd0] sm:$0xff] }
  0x4b   :  { %2952 = vmatprep.mubr.f32.mxu0 %v29_v39  ;;  %v4577_v39 = vld [vmem:[%s5461_s2 + $0xc8] sm:$0xff] }
  0x4e   :  { %2953 = vmatmul.mubr.f32.gmra.mxu0 %v30_v40  ;;  %v4584_v40 = vld [vmem:[%s5461_s2 + $0xc0] sm:$0xff] }
  0x4f   :  { %3022 = vmatprep.mubr.msk.f32.mxu0 %vm3978_vm0, %v3977_v2 }
  0xe2   :  { %v2945_v41 = vpop.f32.mrf.mxu0 }
  0xe3   :  { %v241_v42 = vpop.f32.mrf.mxu1  ;;  %v126_v55 = vadd.f32 %v2945_v41, %v4274_v43  ;;  %v4591_v41 = vld [vmem:[%s5461_s2 + $0xb8] sm:$0xff] }
  0xe4   :  { %v120_v44 = vpop.f32.mrf.mxu0 }
  0xe5   :  { %v2989_v45 = vpop.f32.mrf.mxu1  ;;  %v121_v46 = vadd.f32 %v4274_v43, %v120_v44  ;;  %v4605_v44 = vld [vmem:[%s5461_s2 + $0xa8] sm:$0xff] }
  0xe6   :  { %v4612_v45 = vld [vmem:[%s5461_s2 + $0xa0] sm:$0xff] }
  0xe7   :  { %v245_v47 = vadd.f32 %v241_v42, %v121_v46  ;;  %v4598_v42 = vld [vmem:[%s5461_s2 + $0xb0] sm:$0xff]  ;;  %v4619_v46 = vld [vmem:[%s5461_s2 + $0x98] sm:$0xff] }
  0xe9   :  { %3929 = vtanh.f32 %v245_v47  ;;  %v4626_v47 = vld [vmem:[%s5461_s2 + $0x90] sm:$0xff] }
  0xf6   :  { %v4277_v48 = vpop.eup %3929 }
  0xf7   :  { %3023 = vmatmul.mubr.f32.vlgmr.msra.gmra.mxu0 %v4277_v48 }
  0xf8   :  { %3061 = vmatpush3.msra.mxu0 %v4024_v3  ;;  %3092 = vmatprep.mubr.msk.f32.mxu0 %vm3978_vm0, %v3977_v2 }
  0xf9   :  { %3062 = vmatprep.subr.mxu0 %v3977_v2 }
  0xfa   :  { %3063 = vmatpush3.msra.mxu0 %v4032_v4 }
  0xfb   :  { %3064 = vmatprep.subr.mxu0 %v3977_v2 }
  0xfc   :  { %3065 = vmatpush3.msra.mxu0 %v4041_v6 }
  0xfd   :  { %3066 = vmatprep.subr.mxu0 %v3977_v2 }
  0xfe   :  { %3067 = vmatpush3.msra.mxu0 %v4051_v8 }
  0xff   :  { %3068 = vmatprep.subr.mxu0 %v3977_v2 }
 0x100   :  { %3069 = vmatpush3.msra.mxu0 %v4061_v10 }
 0x101   :  { %3070 = vmatprep.subr.mxu0 %v3977_v2 }
 0x102   :  { %3071 = vmatpush3.msra.mxu0 %v4071_v12 }
 0x103   :  { %3072 = vmatprep.subr.mxu0 %v3977_v2 }
 0x104   :  { %3073 = vmatpush3.msra.mxu0 %v4081_v14 }
 0x105   :  { %3074 = vmatprep.subr.mxu0 %v3977_v2 }
 0x106   :  { %3075 = vmatpush3.msra.mxu0 %v4091_v16  ;;  %v4314_v49 = vpop.f32.mrf.mxu0 }
 0x107   :  { %3076 = vmatprep.subr.mxu0 %v3977_v2  ;;  %v136_v1 = vadd.f32 %v4314_v49, %v4274_v43  ;;  %v4640_v49 = vld [vmem:[%s5461_s2 + $0x80] sm:$0xff] }
 0x108   :  { %3077 = vmatpush3.msra.mxu0 %v4101_v18  ;;  %v130_v50 = vpop.f32.mrf.mxu0 }
 0x109   :  { %3078 = vmatprep.subr.mxu0 %v3977_v2  ;;  %v131_v60 = vadd.f32 %v4274_v43, %v130_v50 }
 0x10a   :  { %3079 = vmatpush3.msra.mxu0 %v4111_v20  ;;  %v4316_v51 = vpop.f32.mrf.mxu0 }
 0x10b   :  { %3080 = vmatprep.subr.mxu0 %v3977_v2 }
 0x10c   :  { %3081 = vmatpush3.msra.mxu0 %v4121_v22  ;;  %v4318_v52 = vpop.f32.mrf.mxu0 }
 0x10d   :  { %3082 = vmatprep.subr.mxu0 %v3977_v2  ;;  %v141_v13 = vadd.f32 %v4274_v43, %v4318_v52 }
 0x10e   :  { %3083 = vmatpush3.msra.mxu0 %v4131_v24  ;;  %v4320_v53 = vpop.f32.mrf.mxu0 }
 0x10f   :  { %3084 = vmatprep.subr.mxu0 %v3977_v2 }
 0x110   :  { %3085 = vmatpush3.msra.mxu0 %v4141_v26  ;;  %v4322_v54 = vpop.f32.mrf.mxu0 }
 0x111   :  { %3086 = vmatprep.subr.mxu0 %v3977_v2  ;;  %v151_v50 = vadd.f32 %v4274_v43, %v4322_v54  ;;  %v156_v54 = vadd.f32 %v4320_v53, %v4274_v43 }
 0x112   :  { %3087 = vmatpush3.msra.mxu0 %v4151_v28 }
 0x113   :  { %3088 = vmatprep.subr.mxu0 %v3977_v2 }
 0x114   :  { %3089 = vmatpush3.msra.mxu0 %v4165_v31 }
 0x115   :  { %3090 = vmatprep.subr.mxu0 %v3977_v2 }
 0x116   :  { %3091 = vmatpush3.msra.mxu0 %v4174_v33 }
 0x117   :  { %3130 = vmatprep.subr.mxu0 %v3977_v2 }
 0x1b7   :  { %v313_v56 = vpop.f32.mrf.mxu0 }
 0x1b8   :  { %v317_v57 = vadd.f32 %v313_v56, %v126_v55 }
 0x1b9   :  { %v3024_v58 = vpop.f32.mrf.mxu0 }
 0x1ba   :  { %3931 = vtanh.f32 %v317_v57 }
 0x1c7   :  { %v4325_v59 = vpop.eup %3931 }
 0x1c8   :  { %3058 = vmatmul.mubr.f32.vlgmr.msra.gmra.mxu1 %v4325_v59 }
 0x1c9   :  { %3096 = vmatpush3.msra.mxu1 %v4024_v3  ;;  %3127 = vmatprep.mubr.msk.f32.mxu1 %vm3978_vm0, %v3977_v2 }
 0x1ca   :  { %3097 = vmatprep.subr.mxu1 %v3977_v2 }
 0x1cb   :  { %3098 = vmatpush3.msra.mxu1 %v4032_v4 }
 0x1cc   :  { %3099 = vmatprep.subr.mxu1 %v3977_v2 }
 0x1cd   :  { %3100 = vmatpush3.msra.mxu1 %v4041_v6 }
 0x1ce   :  { %3101 = vmatprep.subr.mxu1 %v3977_v2 }
 0x1cf   :  { %3102 = vmatpush3.msra.mxu1 %v4051_v8 }
 0x1d0   :  { %3103 = vmatprep.subr.mxu1 %v3977_v2 }
 0x1d1   :  { %3104 = vmatpush3.msra.mxu1 %v4061_v10 }
 0x1d2   :  { %3105 = vmatprep.subr.mxu1 %v3977_v2 }
 0x1d3   :  { %3106 = vmatpush3.msra.mxu1 %v4071_v12 }
 0x1d4   :  { %3107 = vmatprep.subr.mxu1 %v3977_v2 }
 0x1d5   :  { %3108 = vmatpush3.msra.mxu1 %v4081_v14 }
 0x1d6   :  { %3109 = vmatprep.subr.mxu1 %v3977_v2 }
 0x1d7   :  { %3110 = vmatpush3.msra.mxu1 %v4091_v16 }
 0x1d8   :  { %3111 = vmatprep.subr.mxu1 %v3977_v2 }
 0x1d9   :  { %3112 = vmatpush3.msra.mxu1 %v4101_v18 }
 0x1da   :  { %3113 = vmatprep.subr.mxu1 %v3977_v2 }
 0x1db   :  { %3114 = vmatpush3.msra.mxu1 %v4111_v20 }
 0x1dc   :  { %3115 = vmatprep.subr.mxu1 %v3977_v2 }
 0x1dd   :  { %3116 = vmatpush3.msra.mxu1 %v4121_v22 }
 0x1de   :  { %3117 = vmatprep.subr.mxu1 %v3977_v2 }
 0x1df   :  { %3118 = vmatpush3.msra.mxu1 %v4131_v24 }
 0x1e0   :  { %3119 = vmatprep.subr.mxu1 %v3977_v2 }
 0x1e1   :  { %3120 = vmatpush3.msra.mxu1 %v4141_v26 }
 0x1e2   :  { %3121 = vmatprep.subr.mxu1 %v3977_v2 }
 0x1e3   :  { %3122 = vmatpush3.msra.mxu1 %v4151_v28 }
 0x1e4   :  { %3123 = vmatprep.subr.mxu1 %v3977_v2 }
 0x1e5   :  { %3124 = vmatpush3.msra.mxu1 %v4165_v31 }
 0x1e6   :  { %3125 = vmatprep.subr.mxu1 %v3977_v2 }
 0x1e7   :  { %3126 = vmatpush3.msra.mxu1 %v4174_v33 }
 0x1e8   :  { %3165 = vmatprep.subr.mxu1 %v3977_v2 }
 0x288   :  { %v385_v61 = vpop.f32.mrf.mxu1 }
 0x289   :  { %v389_v62 = vadd.f32 %v385_v61, %v131_v60 }
 0x28a   :  { %v3059_v63 = vpop.f32.mrf.mxu1 }
 0x28b   :  { %3933 = vtanh.f32 %v389_v62  ;;  %v4723_v63 = vld [vmem:[%s5463_s3 + $0x1] ss:$0 sm:$0xff] }
 0x298   :  { %v4363_v0 = vpop.eup %3933 }
 0x299   :  { %3093 = vmatmul.mubr.f32.vlgmr.msra.gmra.mxu0 %v4363_v0 }
 0x29a   :  { %3131 = vmatpush3.msra.mxu0 %v4024_v3  ;;  %3162 = vmatprep.mubr.msk.f32.mxu0 %vm3978_vm0, %v3977_v2 }
 0x29b   :  { %3132 = vmatprep.subr.mxu0 %v3977_v2 }
 0x29c   :  { %3133 = vmatpush3.msra.mxu0 %v4032_v4 }
 0x29d   :  { %3134 = vmatprep.subr.mxu0 %v3977_v2 }
 0x29e   :  { %3135 = vmatpush3.msra.mxu0 %v4041_v6 }
 0x29f   :  { %3136 = vmatprep.subr.mxu0 %v3977_v2 }
 0x2a0   :  { %3137 = vmatpush3.msra.mxu0 %v4051_v8 }
 0x2a1   :  { %3138 = vmatprep.subr.mxu0 %v3977_v2 }
 0x2a2   :  { %3139 = vmatpush3.msra.mxu0 %v4061_v10 }
 0x2a3   :  { %3140 = vmatprep.subr.mxu0 %v3977_v2 }
 0x2a4   :  { %3141 = vmatpush3.msra.mxu0 %v4071_v12 }
 0x2a5   :  { %3142 = vmatprep.subr.mxu0 %v3977_v2 }
 0x2a6   :  { %3143 = vmatpush3.msra.mxu0 %v4081_v14 }
 0x2a7   :  { %3144 = vmatprep.subr.mxu0 %v3977_v2 }
 0x2a8   :  { %3145 = vmatpush3.msra.mxu0 %v4091_v16 }
 0x2a9   :  { %3146 = vmatprep.subr.mxu0 %v3977_v2 }
 0x2aa   :  { %3147 = vmatpush3.msra.mxu0 %v4101_v18 }
 0x2ab   :  { %3148 = vmatprep.subr.mxu0 %v3977_v2 }
 0x2ac   :  { %3149 = vmatpush3.msra.mxu0 %v4111_v20 }
 0x2ad   :  { %3150 = vmatprep.subr.mxu0 %v3977_v2 }
 0x2ae   :  { %3151 = vmatpush3.msra.mxu0 %v4121_v22 }
 0x2af   :  { %3152 = vmatprep.subr.mxu0 %v3977_v2 }
 0x2b0   :  { %3153 = vmatpush3.msra.mxu0 %v4131_v24 }
 0x2b1   :  { %3154 = vmatprep.subr.mxu0 %v3977_v2 }
 0x2b2   :  { %3155 = vmatpush3.msra.mxu0 %v4141_v26 }
 0x2b3   :  { %3156 = vmatprep.subr.mxu0 %v3977_v2 }
 0x2b4   :  { %3157 = vmatpush3.msra.mxu0 %v4151_v28 }
 0x2b5   :  { %3158 = vmatprep.subr.mxu0 %v3977_v2 }
 0x2b6   :  { %3159 = vmatpush3.msra.mxu0 %v4165_v31 }
 0x2b7   :  { %3160 = vmatprep.subr.mxu0 %v3977_v2 }
 0x2b8   :  { %3161 = vmatpush3.msra.mxu0 %v4174_v33 }
 0x2b9   :  { %3200 = vmatprep.subr.mxu0 %v3977_v2 }
 0x359   :  { %v457_v5 = vpop.f32.mrf.mxu0 }
 0x35a   :  { %v461_v7 = vadd.f32 %v457_v5, %v136_v1 }
 0x35b   :  { %v3094_v9 = vpop.f32.mrf.mxu0 }
 0x35c   :  { %3935 = vtanh.f32 %v461_v7 }
 0x369   :  { %v4402_v11 = vpop.eup %3935 }
 0x36a   :  { %3128 = vmatmul.mubr.f32.vlgmr.msra.gmra.mxu1 %v4402_v11 }
 0x36b   :  { %3166 = vmatpush3.msra.mxu1 %v4024_v3  ;;  %3197 = vmatprep.mubr.msk.f32.mxu1 %vm3978_vm0, %v3977_v2 }
 0x36c   :  { %3167 = vmatprep.subr.mxu1 %v3977_v2 }
 0x36d   :  { %3168 = vmatpush3.msra.mxu1 %v4032_v4 }
 0x36e   :  { %3169 = vmatprep.subr.mxu1 %v3977_v2 }
 0x36f   :  { %3170 = vmatpush3.msra.mxu1 %v4041_v6 }
 0x370   :  { %3171 = vmatprep.subr.mxu1 %v3977_v2 }
 0x371   :  { %3172 = vmatpush3.msra.mxu1 %v4051_v8 }
 0x372   :  { %3173 = vmatprep.subr.mxu1 %v3977_v2 }
 0x373   :  { %3174 = vmatpush3.msra.mxu1 %v4061_v10 }
 0x374   :  { %3175 = vmatprep.subr.mxu1 %v3977_v2 }
 0x375   :  { %3176 = vmatpush3.msra.mxu1 %v4071_v12 }
 0x376   :  { %3177 = vmatprep.subr.mxu1 %v3977_v2 }
 0x377   :  { %3178 = vmatpush3.msra.mxu1 %v4081_v14 }
 0x378   :  { %3179 = vmatprep.subr.mxu1 %v3977_v2 }
 0x379   :  { %3180 = vmatpush3.msra.mxu1 %v4091_v16 }
 0x37a   :  { %3181 = vmatprep.subr.mxu1 %v3977_v2 }
 0x37b   :  { %3182 = vmatpush3.msra.mxu1 %v4101_v18 }
 0x37c   :  { %3183 = vmatprep.subr.mxu1 %v3977_v2 }
 0x37d   :  { %3184 = vmatpush3.msra.mxu1 %v4111_v20 }
 0x37e   :  { %3185 = vmatprep.subr.mxu1 %v3977_v2 }
 0x37f   :  { %3186 = vmatpush3.msra.mxu1 %v4121_v22 }
 0x380   :  { %3187 = vmatprep.subr.mxu1 %v3977_v2 }
 0x381   :  { %3188 = vmatpush3.msra.mxu1 %v4131_v24 }
 0x382   :  { %3189 = vmatprep.subr.mxu1 %v3977_v2 }
 0x383   :  { %3190 = vmatpush3.msra.mxu1 %v4141_v26 }
 0x384   :  { %3191 = vmatprep.subr.mxu1 %v3977_v2 }
 0x385   :  { %3192 = vmatpush3.msra.mxu1 %v4151_v28 }
 0x386   :  { %3193 = vmatprep.subr.mxu1 %v3977_v2 }
 0x387   :  { %3194 = vmatpush3.msra.mxu1 %v4165_v31 }
 0x388   :  { %3195 = vmatprep.subr.mxu1 %v3977_v2 }
 0x389   :  { %3196 = vmatpush3.msra.mxu1 %v4174_v33 }
 0x42a   :  { %v529_v15 = vpop.f32.mrf.mxu1 }
 0x42b   :  { %v533_v17 = vadd.f32 %v529_v15, %v141_v13 }
 0x42c   :  { %v3129_v19 = vpop.f32.mrf.mxu1 }
 0x42d   :  { %3937 = vtanh.f32 %v533_v17 }
 0x43a   :  { %v4440_v21 = vpop.eup %3937 }
 0x43b   :  { %3163 = vmatmul.mubr.f32.vlgmr.msra.gmra.mxu0 %v4440_v21 }
 0x43c   :  { %3201 = vmatpush3.msra.mxu0 %v4024_v3  ;;  %3232 = vmatprep.mubr.msk.f32.mxu0 %vm3978_vm0, %v3977_v2  ;;  %v2353_v3 = vld [vmem:[%s5460_s1 + $0xf8] sm:$0xff] }
 0x43d   :  { %3202 = vmatprep.subr.mxu0 %v3977_v2  ;;  %3235 = vmatprep.subr.mxu1 %v2353_v3 }
 0x43e   :  { %3203 = vmatpush3.msra.mxu0 %v4032_v4  ;;  %v146_v4 = vadd.f32 %v4316_v51, %v4274_v43 }
 0x43f   :  { %3204 = vmatprep.subr.mxu0 %v3977_v2 }
 0x440   :  { %3205 = vmatpush3.msra.mxu0 %v4041_v6 }
 0x441   :  { %3206 = vmatprep.subr.mxu0 %v3977_v2 }
 0x442   :  { %3207 = vmatpush3.msra.mxu0 %v4051_v8 }
 0x443   :  { %3208 = vmatprep.subr.mxu0 %v3977_v2 }
 0x444   :  { %3209 = vmatpush3.msra.mxu0 %v4061_v10 }
 0x445   :  { %3210 = vmatprep.subr.mxu0 %v3977_v2 }
 0x446   :  { %3211 = vmatpush3.msra.mxu0 %v4071_v12 }
 0x447   :  { %3212 = vmatprep.subr.mxu0 %v3977_v2 }
 0x448   :  { %3213 = vmatpush3.msra.mxu0 %v4081_v14  ;;  %v2352_v14 = vld [vmem:[%s5460_s1 + $0xf0] sm:$0xff] }
 0x449   :  { %3214 = vmatprep.subr.mxu0 %v3977_v2 }
 0x44a   :  { %3215 = vmatpush3.msra.mxu0 %v4091_v16  ;;  %v2351_v16 = vld [vmem:[%s5460_s1 + $0xe8] sm:$0xff] }
 0x44b   :  { %3216 = vmatprep.subr.mxu0 %v3977_v2 }
 0x44c   :  { %3217 = vmatpush3.msra.mxu0 %v4101_v18  ;;  %v2350_v18 = vld [vmem:[%s5460_s1 + $0xe0] sm:$0xff] }
 0x44d   :  { %3218 = vmatprep.subr.mxu0 %v3977_v2 }
 0x44e   :  { %3219 = vmatpush3.msra.mxu0 %v4111_v20  ;;  %v2349_v20 = vld [vmem:[%s5460_s1 + $0xd8] sm:$0xff] }
 0x44f   :  { %3220 = vmatprep.subr.mxu0 %v3977_v2 }
 0x450   :  { %3221 = vmatpush3.msra.mxu0 %v4121_v22  ;;  %v2348_v22 = vld [vmem:[%s5460_s1 + $0xd0] sm:$0xff] }
 0x451   :  { %3222 = vmatprep.subr.mxu0 %v3977_v2 }
 0x452   :  { %3223 = vmatpush3.msra.mxu0 %v4131_v24  ;;  %v2346_v24 = vld [vmem:[%s5460_s1 + $0xc0] sm:$0xff] }
 0x453   :  { %3224 = vmatprep.subr.mxu0 %v3977_v2 }
 0x454   :  { %3225 = vmatpush3.msra.mxu0 %v4141_v26  ;;  %v2344_v26 = vld [vmem:[%s5460_s1 + $0xb0] sm:$0xff] }
 0x455   :  { %3226 = vmatprep.subr.mxu0 %v3977_v2 }
 0x456   :  { %3227 = vmatpush3.msra.mxu0 %v4151_v28  ;;  %v2342_v28 = vld [vmem:[%s5460_s1 + $0xa0] sm:$0xff] }
 0x457   :  { %3228 = vmatprep.subr.mxu0 %v3977_v2 }
 0x458   :  { %3229 = vmatpush3.msra.mxu0 %v4165_v31  ;;  %v2339_v31 = vld [vmem:[%s5460_s1 + $0x88] sm:$0xff] }
 0x459   :  { %3230 = vmatprep.subr.mxu0 %v3977_v2 }
 0x45a   :  { %3231 = vmatpush3.msra.mxu0 %v4174_v33  ;;  %v4536_v33 = vld [vmem:[%s5461_s2 + $0xf8] sm:$0xff] }
 0x45b   :  { %3279 = vmatprep.subr.mxu0 %v3977_v2 }
 0x4fb   :  { %v601_v6 = vpop.f32.mrf.mxu0 }
 0x4fc   :  { %v605_v8 = vadd.f32 %v601_v6, %v146_v4 }
 0x4fd   :  { %v3164_v10 = vpop.f32.mrf.mxu0 }
 0x4fe   :  { %3939 = vtanh.f32 %v605_v8 }
 0x50b   :  { %v3940_v12 = vpop.eup %3939 }
 0x50c   :  { %3198 = vmatmul.mubr.f32.vlgmr.msra.gmra.mxu1 %v3940_v12 }
 0x50d   :  { %3236 = vmatpush3.msra.mxu1 %v2353_v3  ;;  %3267 = vmatprep.mubr.f32.mxu1 %v4277_v48  ;;  %v4633_v48 = vld [vmem:[%s5461_s2 + $0x88] sm:$0xff] }
 0x50e   :  { %3237 = vmatprep.subr.mxu1 %v2352_v14 }
 0x50f   :  { %3238 = vmatpush3.msra.mxu1 %v2352_v14 }
 0x510   :  { %3239 = vmatprep.subr.mxu1 %v2351_v16 }
 0x511   :  { %3240 = vmatpush3.msra.mxu1 %v2351_v16 }
 0x512   :  { %3241 = vmatprep.subr.mxu1 %v2350_v18 }
 0x513   :  { %3242 = vmatpush3.msra.mxu1 %v2350_v18 }
 0x514   :  { %3243 = vmatprep.subr.mxu1 %v2349_v20 }
 0x515   :  { %3244 = vmatpush3.msra.mxu1 %v2349_v20 }
 0x516   :  { %3245 = vmatprep.subr.mxu1 %v2348_v22 }
 0x517   :  { %3246 = vmatpush3.msra.mxu1 %v2348_v22 }
 0x518   :  { %3247 = vmatprep.subr.mxu1 %v2347_v23 }
 0x519   :  { %3248 = vmatpush3.msra.mxu1 %v2347_v23 }
 0x51a   :  { %3249 = vmatprep.subr.mxu1 %v2346_v24 }
 0x51b   :  { %3250 = vmatpush3.msra.mxu1 %v2346_v24 }
 0x51c   :  { %3251 = vmatprep.subr.mxu1 %v2345_v25 }
 0x51d   :  { %3252 = vmatpush3.msra.mxu1 %v2345_v25 }
 0x51e   :  { %3253 = vmatprep.subr.mxu1 %v2344_v26 }
 0x51f   :  { %3254 = vmatpush3.msra.mxu1 %v2344_v26 }
 0x520   :  { %3255 = vmatprep.subr.mxu1 %v2343_v27 }
 0x521   :  { %3256 = vmatpush3.msra.mxu1 %v2343_v27 }
 0x522   :  { %3257 = vmatprep.subr.mxu1 %v2342_v28 }
 0x523   :  { %3258 = vmatpush3.msra.mxu1 %v2342_v28 }
 0x524   :  { %3259 = vmatprep.subr.mxu1 %v2341_v29 }
 0x525   :  { %3260 = vmatpush3.msra.mxu1 %v2341_v29 }
 0x526   :  { %3261 = vmatprep.subr.mxu1 %v2340_v30 }
 0x527   :  { %3262 = vmatpush3.msra.mxu1 %v2340_v30  ;;  %v2387_v30 = vld [vmem:[%s5460_s1 + $0x178] sm:$0xff] }
 0x528   :  { %3263 = vmatprep.subr.mxu1 %v2339_v31 }
 0x529   :  { %3264 = vmatpush3.msra.mxu1 %v2339_v31 }
 0x52a   :  { %3265 = vmatprep.subr.mxu1 %v2338_v32 }
 0x52b   :  { %3266 = vmatpush3.msra.mxu1 %v2338_v32 }
 0x52c   :  { %3268 = vmatmul.mubr.f32.vlgmr.msra.gmra.mxu1 %v4325_v59  ;;  %3314 = vmatprep.subr.mxu1 %v3977_v2 }
 0x52d   :  { %3270 = vmatprep.mubr.f32.mxu1 %v4363_v0  ;;  %3315 = vmatpush3.msra.mxu1 %v4536_v33 }
 0x52e   :  { %3316 = vmatprep.subr.mxu1 %v3977_v2 }
 0x52f   :  { %3317 = vmatpush3.msra.mxu1 %v4542_v34 }
 0x530   :  { %3271 = vmatmul.mubr.f32.gmra.mxu1 %v4402_v11  ;;  %3318 = vmatprep.subr.mxu1 %v3977_v2 }
 0x531   :  { %3273 = vmatprep.mubr.f32.mxu1 %v4440_v21  ;;  %3319 = vmatpush3.msra.mxu1 %v4549_v35 }
 0x532   :  { %3320 = vmatprep.subr.mxu1 %v3977_v2 }
 0x533   :  { %3321 = vmatpush3.msra.mxu1 %v4556_v36 }
 0x534   :  { %3274 = vmatmul.mubr.f32.gmra.mxu1 %v3940_v12  ;;  %3322 = vmatprep.subr.mxu1 %v3977_v2 }
 0x535   :  { %3323 = vmatpush3.msra.mxu1 %v4563_v37 }
 0x536   :  { %3324 = vmatprep.subr.mxu1 %v3977_v2 }
 0x537   :  { %3325 = vmatpush3.msra.mxu1 %v4570_v38 }
 0x538   :  { %3326 = vmatprep.subr.mxu1 %v3977_v2 }
 0x539   :  { %3327 = vmatpush3.msra.mxu1 %v4577_v39 }
 0x53a   :  { %3328 = vmatprep.subr.mxu1 %v3977_v2 }
 0x53b   :  { %3329 = vmatpush3.msra.mxu1 %v4584_v40 }
 0x53c   :  { %3330 = vmatprep.subr.mxu1 %v3977_v2 }
 0x53d   :  { %3331 = vmatpush3.msra.mxu1 %v4591_v41 }
 0x53e   :  { %3332 = vmatprep.subr.mxu1 %v3977_v2 }
 0x53f   :  { %3333 = vmatpush3.msra.mxu1 %v4598_v42 }
 0x540   :  { %3334 = vmatprep.subr.mxu1 %v3977_v2 }
 0x541   :  { %3335 = vmatpush3.msra.mxu1 %v4605_v44 }
 0x542   :  { %3336 = vmatprep.subr.mxu1 %v3977_v2 }
 0x543   :  { %3337 = vmatpush3.msra.mxu1 %v4612_v45 }
 0x544   :  { %3338 = vmatprep.subr.mxu1 %v3977_v2 }
 0x545   :  { %3339 = vmatpush3.msra.mxu1 %v4619_v46 }
 0x546   :  { %3340 = vmatprep.subr.mxu1 %v3977_v2 }
 0x547   :  { %3341 = vmatpush3.msra.mxu1 %v4626_v47 }
 0x548   :  { %3342 = vmatprep.subr.mxu1 %v3977_v2 }
 0x549   :  { %3343 = vmatpush3.msra.mxu1 %v4633_v48 }
 0x54a   :  { %3344 = vmatprep.subr.mxu1 %v3977_v2 }
 0x54b   :  { %3345 = vmatpush3.msra.mxu1 %v4640_v49 }
 0x54c   :  { %3384 = vmatprep.subr.mxu1 %v3977_v2 }
 0x5cc   :  { %v673_v51 = vpop.f32.mrf.mxu1 }
 0x5cd   :  { %v677_v52 = vadd.f32 %v673_v51, %v151_v50  ;;  %v2373_v50 = vld [vmem:[%s5460_s1 + $0x108] sm:$0xff]  ;;  %v2372_v51 = vld [vmem:[%s5460_s1 + $0x100] sm:$0xff] }
 0x5ce   :  { %v3199_v55 = vpop.f32.mrf.mxu1 }
 0x5cf   :  { %3941 = vtanh.f32 %v677_v52  ;;  %v4985_v52 = vld [vmem:[%s5461_s2 + $0x178] sm:$0xff]  ;;  %v4991_v55 = vld [vmem:[%s5461_s2 + $0x170] sm:$0xff] }
 0x5dc   :  { %v3942_v56 = vpop.eup %3941 }
 0x5dd   :  { %3233 = vmatmul.mubr.f32.vlgmr.msra.gmra.mxu0 %v3942_v56  ;;  %3276 = vmatprep.mubr.f32.mxu1 %v3942_v56  ;;  %v4998_v56 = vld [vmem:[%s5461_s2 + $0x168] sm:$0xff] }
 0x5de   :  { %3280 = vmatpush3.msra.mxu0 %v4536_v33  ;;  %3311 = vmatprep.mubr.msk.f32.mxu0 %vm3978_vm0, %v3977_v2 }
 0x5df   :  { %3281 = vmatprep.subr.mxu0 %v3977_v2 }
 0x5e0   :  { %3282 = vmatpush3.msra.mxu0 %v4542_v34 }
 0x5e1   :  { %3283 = vmatprep.subr.mxu0 %v3977_v2 }
 0x5e2   :  { %3284 = vmatpush3.msra.mxu0 %v4549_v35 }
 0x5e3   :  { %3285 = vmatprep.subr.mxu0 %v3977_v2 }
 0x5e4   :  { %3286 = vmatpush3.msra.mxu0 %v4556_v36 }
 0x5e5   :  { %3287 = vmatprep.subr.mxu0 %v3977_v2 }
 0x5e6   :  { %3288 = vmatpush3.msra.mxu0 %v4563_v37 }
 0x5e7   :  { %3289 = vmatprep.subr.mxu0 %v3977_v2 }
 0x5e8   :  { %3290 = vmatpush3.msra.mxu0 %v4570_v38 }
 0x5e9   :  { %3291 = vmatprep.subr.mxu0 %v3977_v2 }
 0x5ea   :  { %3292 = vmatpush3.msra.mxu0 %v4577_v39 }
 0x5eb   :  { %3293 = vmatprep.subr.mxu0 %v3977_v2 }
 0x5ec   :  { %3294 = vmatpush3.msra.mxu0 %v4584_v40  ;;  %v3269_v61 = vpop.f32.mrf.mxu1 }
 0x5ed   :  { %3295 = vmatprep.subr.mxu0 %v3977_v2  ;;  %v848_v19 = vadd.f32 %v3269_v61, %v4723_v63  ;;  %v5040_v61 = vld [vmem:[%s5461_s2 + $0x138] sm:$0xff] }
 0x5ee   :  { %3296 = vmatpush3.msra.mxu0 %v4591_v41  ;;  %v842_v62 = vpop.f32.mrf.mxu1 }
 0x5ef   :  { %3297 = vmatprep.subr.mxu0 %v3977_v2  ;;  %v843_v0 = vadd.f32 %v4723_v63, %v842_v62  ;;  %v5047_v62 = vld [vmem:[%s5461_s2 + $0x130] sm:$0xff] }
 0x5f0   :  { %3298 = vmatpush3.msra.mxu0 %v4598_v42  ;;  %v4763_v7 = vpop.f32.mrf.mxu1 }
 0x5f1   :  { %3299 = vmatprep.subr.mxu0 %v3977_v2  ;;  %v858_v18 = vadd.f32 %v4763_v7, %v4723_v63  ;;  %v5089_v7 = vld [vmem:[%s5461_s2 + $0x100] sm:$0xff] }
 0x5f2   :  { %3300 = vmatpush3.msra.mxu0 %v4605_v44  ;;  %v852_v9 = vpop.f32.mrf.mxu1 }
 0x5f3   :  { %3301 = vmatprep.subr.mxu0 %v3977_v2  ;;  %v853_v8 = vadd.f32 %v4723_v63, %v852_v9 }
 0x5f4   :  { %3302 = vmatpush3.msra.mxu0 %v4612_v45  ;;  %v4765_v11 = vpop.f32.mrf.mxu1 }
 0x5f5   :  { %3303 = vmatprep.subr.mxu0 %v3977_v2  ;;  %v868_v31 = vadd.f32 %v4765_v11, %v4723_v63 }
 0x5f6   :  { %3304 = vmatpush3.msra.mxu0 %v4619_v46  ;;  %v4767_v13 = vpop.f32.mrf.mxu1 }
 0x5f7   :  { %3305 = vmatprep.subr.mxu0 %v3977_v2  ;;  %v863_v25 = vadd.f32 %v4723_v63, %v4767_v13 }
 0x5f8   :  { %3306 = vmatpush3.msra.mxu0 %v4626_v47 }
 0x5f9   :  { %3307 = vmatprep.subr.mxu0 %v3977_v2 }
 0x5fa   :  { %3308 = vmatpush3.msra.mxu0 %v4633_v48 }
 0x5fb   :  { %3309 = vmatprep.subr.mxu0 %v3977_v2 }
 0x5fc   :  { %3310 = vmatpush3.msra.mxu0 %v4640_v49 }
 0x5fd   :  { %3312 = vmatmul.mubr.f32.vlgmr.msra.gmra.mxu0 %v3977_v2  ;;  %3349 = vmatprep.subr.mxu0 %v3977_v2 }
 0x5fe   :  { %3350 = vmatpush3.msra.mxu0 %v4536_v33  ;;  %3381 = vmatprep.mubr.msk.f32.mxu0 %vm3978_vm0, %v3977_v2 }
 0x5ff   :  { %3351 = vmatprep.subr.mxu0 %v3977_v2 }
 0x600   :  { %3352 = vmatpush3.msra.mxu0 %v4542_v34 }
 0x601   :  { %3353 = vmatprep.subr.mxu0 %v3977_v2 }
 0x602   :  { %3354 = vmatpush3.msra.mxu0 %v4549_v35 }
 0x603   :  { %3355 = vmatprep.subr.mxu0 %v3977_v2 }
 0x604   :  { %3356 = vmatpush3.msra.mxu0 %v4556_v36 }
 0x605   :  { %3357 = vmatprep.subr.mxu0 %v3977_v2 }
 0x606   :  { %3358 = vmatpush3.msra.mxu0 %v4563_v37 }
 0x607   :  { %3359 = vmatprep.subr.mxu0 %v3977_v2 }
 0x608   :  { %3360 = vmatpush3.msra.mxu0 %v4570_v38 }
 0x609   :  { %3361 = vmatprep.subr.mxu0 %v3977_v2 }
 0x60a   :  { %3362 = vmatpush3.msra.mxu0 %v4577_v39 }
 0x60b   :  { %3363 = vmatprep.subr.mxu0 %v3977_v2 }
 0x60c   :  { %3364 = vmatpush3.msra.mxu0 %v4584_v40 }
 0x60d   :  { %3365 = vmatprep.subr.mxu0 %v3977_v2 }
 0x60e   :  { %3366 = vmatpush3.msra.mxu0 %v4591_v41 }
 0x60f   :  { %3367 = vmatprep.subr.mxu0 %v3977_v2 }
 0x610   :  { %3368 = vmatpush3.msra.mxu0 %v4598_v42 }
 0x611   :  { %3369 = vmatprep.subr.mxu0 %v3977_v2 }
 0x612   :  { %3370 = vmatpush3.msra.mxu0 %v4605_v44 }
 0x613   :  { %3371 = vmatprep.subr.mxu0 %v3977_v2 }
 0x614   :  { %3372 = vmatpush3.msra.mxu0 %v4612_v45 }
 0x615   :  { %3373 = vmatprep.subr.mxu0 %v3977_v2 }
 0x616   :  { %3374 = vmatpush3.msra.mxu0 %v4619_v46 }
 0x617   :  { %3375 = vmatprep.subr.mxu0 %v3977_v2 }
 0x618   :  { %3376 = vmatpush3.msra.mxu0 %v4626_v47 }
 0x619   :  { %3377 = vmatprep.subr.mxu0 %v3977_v2 }
 0x61a   :  { %3378 = vmatpush3.msra.mxu0 %v4633_v48 }
 0x61b   :  { %3379 = vmatprep.subr.mxu0 %v3977_v2 }
 0x61c   :  { %3380 = vmatpush3.msra.mxu0 %v4640_v49 }
 0x61d   :  { %3419 = vmatprep.subr.mxu0 %v3977_v2 }
 0x69d   :  { %v745_v57 = vpop.f32.mrf.mxu0 }
 0x69e   :  { %v749_v58 = vadd.f32 %v745_v57, %v156_v54  ;;  %v5005_v54 = vld [vmem:[%s5461_s2 + $0x160] sm:$0xff]  ;;  %v5012_v57 = vld [vmem:[%s5461_s2 + $0x158] sm:$0xff] }
 0x69f   :  { %v3234_v59 = vpop.f32.mrf.mxu0 }
 0x6a0   :  { %3943 = vtanh.f32 %v749_v58  ;;  %v5019_v58 = vld [vmem:[%s5461_s2 + $0x150] sm:$0xff]  ;;  %v5026_v59 = vld [vmem:[%s5461_s2 + $0x148] sm:$0xff] }
 0x6ad   :  { %v3944_v60 = vpop.eup %3943 }
 0x6ae   :  { %3277 = vmatmul.mubr.f32.gmra.mxu1 %v3944_v60  ;;  %v5033_v60 = vld [vmem:[%s5461_s2 + $0x140] sm:$0xff] }
 0x6af   :  { %3346 = vmatprep.mubr.msk.f32.mxu1 %vm3978_vm0, %v3977_v2 }
 0x6bd   :  { %v964_v1 = vpop.f32.mrf.mxu0 }
 0x6be   :  { %v968_v43 = vadd.f32 %v964_v1, %v843_v0  ;;  %v5054_v0 = vld [vmem:[%s5461_s2 + $0x128] sm:$0xff]  ;;  %v5061_v1 = vld [vmem:[%s5461_s2 + $0x120] sm:$0xff] }
 0x6bf   :  { %v3313_v53 = vpop.f32.mrf.mxu0 }
 0x6c0   :  { %3945 = vtanh.f32 %v968_v43  ;;  %v5068_v43 = vld [vmem:[%s5461_s2 + $0x118] sm:$0xff]  ;;  %v5075_v53 = vld [vmem:[%s5461_s2 + $0x110] sm:$0xff] }
 0x6cd   :  { %v4726_v5 = vpop.eup %3945 }
 0x6ce   :  { %3347 = vmatmul.mubr.f32.vlgmr.msra.gmra.mxu1 %v4726_v5 }
 0x6cf   :  { %3385 = vmatpush3.msra.mxu1 %v4536_v33  ;;  %3416 = vmatprep.mubr.msk.f32.mxu1 %vm3978_vm0, %v3977_v2 }
 0x6d0   :  { %3386 = vmatprep.subr.mxu1 %v3977_v2 }
 0x6d1   :  { %3387 = vmatpush3.msra.mxu1 %v4542_v34 }
 0x6d2   :  { %3388 = vmatprep.subr.mxu1 %v3977_v2 }
 0x6d3   :  { %3389 = vmatpush3.msra.mxu1 %v4549_v35 }
 0x6d4   :  { %3390 = vmatprep.subr.mxu1 %v3977_v2 }
 0x6d5   :  { %3391 = vmatpush3.msra.mxu1 %v4556_v36 }
 0x6d6   :  { %3392 = vmatprep.subr.mxu1 %v3977_v2 }
 0x6d7   :  { %3393 = vmatpush3.msra.mxu1 %v4563_v37 }
 0x6d8   :  { %3394 = vmatprep.subr.mxu1 %v3977_v2 }
 0x6d9   :  { %3395 = vmatpush3.msra.mxu1 %v4570_v38 }
 0x6da   :  { %3396 = vmatprep.subr.mxu1 %v3977_v2 }
 0x6db   :  { %3397 = vmatpush3.msra.mxu1 %v4577_v39 }
 0x6dc   :  { %3398 = vmatprep.subr.mxu1 %v3977_v2 }
 0x6dd   :  { %3399 = vmatpush3.msra.mxu1 %v4584_v40 }
 0x6de   :  { %3400 = vmatprep.subr.mxu1 %v3977_v2 }
 0x6df   :  { %3401 = vmatpush3.msra.mxu1 %v4591_v41 }
 0x6e0   :  { %3402 = vmatprep.subr.mxu1 %v3977_v2 }
 0x6e1   :  { %3403 = vmatpush3.msra.mxu1 %v4598_v42 }
 0x6e2   :  { %3404 = vmatprep.subr.mxu1 %v3977_v2 }
 0x6e3   :  { %3405 = vmatpush3.msra.mxu1 %v4605_v44 }
 0x6e4   :  { %3406 = vmatprep.subr.mxu1 %v3977_v2 }
 0x6e5   :  { %3407 = vmatpush3.msra.mxu1 %v4612_v45 }
 0x6e6   :  { %3408 = vmatprep.subr.mxu1 %v3977_v2 }
 0x6e7   :  { %3409 = vmatpush3.msra.mxu1 %v4619_v46 }
 0x6e8   :  { %3410 = vmatprep.subr.mxu1 %v3977_v2 }
 0x6e9   :  { %3411 = vmatpush3.msra.mxu1 %v4626_v47 }
 0x6ea   :  { %3412 = vmatprep.subr.mxu1 %v3977_v2 }
 0x6eb   :  { %3413 = vmatpush3.msra.mxu1 %v4633_v48 }
 0x6ec   :  { %3414 = vmatprep.subr.mxu1 %v3977_v2 }
 0x6ed   :  { %3415 = vmatpush3.msra.mxu1 %v4640_v49 }
 0x6ee   :  { %3454 = vmatprep.subr.mxu1 %v3977_v2 }
 0x76e   :  { %v4769_v15 = vpop.f32.mrf.mxu1 }
 0x770   :  { %v4771_v17 = vpop.f32.mrf.mxu1 }
 0x771   :  { %v873_v9 = vadd.f32 %v4723_v63, %v4771_v17  ;;  %v878_v17 = vadd.f32 %v4769_v15, %v4723_v63 }
 0x78e   :  { %v1036_v21 = vpop.f32.mrf.mxu1 }
 0x78f   :  { %v1040_v3 = vadd.f32 %v1036_v21, %v848_v19 }
 0x790   :  { %v3348_v4 = vpop.f32.mrf.mxu1 }
 0x791   :  { %3947 = vtanh.f32 %v1040_v3 }
 0x79e   :  { %v4774_v6 = vpop.eup %3947 }
 0x79f   :  { %3382 = vmatmul.mubr.f32.vlgmr.msra.gmra.mxu0 %v4774_v6 }
 0x7a0   :  { %3420 = vmatpush3.msra.mxu0 %v4536_v33  ;;  %3451 = vmatprep.mubr.msk.f32.mxu0 %vm3978_vm0, %v3977_v2 }
 0x7a1   :  { %3421 = vmatprep.subr.mxu0 %v3977_v2 }
 0x7a2   :  { %3422 = vmatpush3.msra.mxu0 %v4542_v34 }
 0x7a3   :  { %3423 = vmatprep.subr.mxu0 %v3977_v2 }
 0x7a4   :  { %3424 = vmatpush3.msra.mxu0 %v4549_v35 }
 0x7a5   :  { %3425 = vmatprep.subr.mxu0 %v3977_v2 }
 0x7a6   :  { %3426 = vmatpush3.msra.mxu0 %v4556_v36 }
 0x7a7   :  { %3427 = vmatprep.subr.mxu0 %v3977_v2 }
 0x7a8   :  { %3428 = vmatpush3.msra.mxu0 %v4563_v37 }
 0x7a9   :  { %3429 = vmatprep.subr.mxu0 %v3977_v2 }
 0x7aa   :  { %3430 = vmatpush3.msra.mxu0 %v4570_v38 }
 0x7ab   :  { %3431 = vmatprep.subr.mxu0 %v3977_v2 }
 0x7ac   :  { %3432 = vmatpush3.msra.mxu0 %v4577_v39 }
 0x7ad   :  { %3433 = vmatprep.subr.mxu0 %v3977_v2 }
 0x7ae   :  { %3434 = vmatpush3.msra.mxu0 %v4584_v40 }
 0x7af   :  { %3435 = vmatprep.subr.mxu0 %v3977_v2 }
 0x7b0   :  { %3436 = vmatpush3.msra.mxu0 %v4591_v41 }
 0x7b1   :  { %3437 = vmatprep.subr.mxu0 %v3977_v2 }
 0x7b2   :  { %3438 = vmatpush3.msra.mxu0 %v4598_v42 }
 0x7b3   :  { %3439 = vmatprep.subr.mxu0 %v3977_v2 }
 0x7b4   :  { %3440 = vmatpush3.msra.mxu0 %v4605_v44 }
 0x7b5   :  { %3441 = vmatprep.subr.mxu0 %v3977_v2 }
 0x7b6   :  { %3442 = vmatpush3.msra.mxu0 %v4612_v45 }
 0x7b7   :  { %3443 = vmatprep.subr.mxu0 %v3977_v2 }
 0x7b8   :  { %3444 = vmatpush3.msra.mxu0 %v4619_v46 }
 0x7b9   :  { %3445 = vmatprep.subr.mxu0 %v3977_v2 }
 0x7ba   :  { %3446 = vmatpush3.msra.mxu0 %v4626_v47 }
 0x7bb   :  { %3447 = vmatprep.subr.mxu0 %v3977_v2 }
 0x7bc   :  { %3448 = vmatpush3.msra.mxu0 %v4633_v48 }
 0x7bd   :  { %3449 = vmatprep.subr.mxu0 %v3977_v2 }
 0x7be   :  { %3450 = vmatpush3.msra.mxu0 %v4640_v49 }
 0x7bf   :  { %3489 = vmatprep.subr.mxu0 %v3977_v2 }
 0x85f   :  { %v1108_v10 = vpop.f32.mrf.mxu0 }
 0x860   :  { %v1112_v12 = vadd.f32 %v1108_v10, %v853_v8 }
 0x861   :  { %v3383_v14 = vpop.f32.mrf.mxu0 }
 0x862   :  { %3949 = vtanh.f32 %v1112_v12  ;;  %v5172_v14 = vld [vmem:[%s5463_s3 + $0x2] ss:$0 sm:$0xff] }
 0x86f   :  { %v4812_v16 = vpop.eup %3949 }
 0x870   :  { %3417 = vmatmul.mubr.f32.vlgmr.msra.gmra.mxu1 %v4812_v16 }
 0x871   :  { %3455 = vmatpush3.msra.mxu1 %v4536_v33  ;;  %3486 = vmatprep.mubr.msk.f32.mxu1 %vm3978_vm0, %v3977_v2 }
 0x872   :  { %3456 = vmatprep.subr.mxu1 %v3977_v2 }
 0x873   :  { %3457 = vmatpush3.msra.mxu1 %v4542_v34 }
 0x874   :  { %3458 = vmatprep.subr.mxu1 %v3977_v2 }
 0x875   :  { %3459 = vmatpush3.msra.mxu1 %v4549_v35 }
 0x876   :  { %3460 = vmatprep.subr.mxu1 %v3977_v2 }
 0x877   :  { %3461 = vmatpush3.msra.mxu1 %v4556_v36 }
 0x878   :  { %3462 = vmatprep.subr.mxu1 %v3977_v2 }
 0x879   :  { %3463 = vmatpush3.msra.mxu1 %v4563_v37 }
 0x87a   :  { %3464 = vmatprep.subr.mxu1 %v3977_v2 }
 0x87b   :  { %3465 = vmatpush3.msra.mxu1 %v4570_v38 }
 0x87c   :  { %3466 = vmatprep.subr.mxu1 %v3977_v2 }
 0x87d   :  { %3467 = vmatpush3.msra.mxu1 %v4577_v39 }
 0x87e   :  { %3468 = vmatprep.subr.mxu1 %v3977_v2 }
 0x87f   :  { %3469 = vmatpush3.msra.mxu1 %v4584_v40 }
 0x880   :  { %3470 = vmatprep.subr.mxu1 %v3977_v2 }
 0x881   :  { %3471 = vmatpush3.msra.mxu1 %v4591_v41 }
 0x882   :  { %3472 = vmatprep.subr.mxu1 %v3977_v2 }
 0x883   :  { %3473 = vmatpush3.msra.mxu1 %v4598_v42 }
 0x884   :  { %3474 = vmatprep.subr.mxu1 %v3977_v2 }
 0x885   :  { %3475 = vmatpush3.msra.mxu1 %v4605_v44 }
 0x886   :  { %3476 = vmatprep.subr.mxu1 %v3977_v2 }
 0x887   :  { %3477 = vmatpush3.msra.mxu1 %v4612_v45 }
 0x888   :  { %3478 = vmatprep.subr.mxu1 %v3977_v2 }
 0x889   :  { %3479 = vmatpush3.msra.mxu1 %v4619_v46 }
 0x88a   :  { %3480 = vmatprep.subr.mxu1 %v3977_v2 }
 0x88b   :  { %3481 = vmatpush3.msra.mxu1 %v4626_v47 }
 0x88c   :  { %3482 = vmatprep.subr.mxu1 %v3977_v2 }
 0x88d   :  { %3483 = vmatpush3.msra.mxu1 %v4633_v48 }
 0x88e   :  { %3484 = vmatprep.subr.mxu1 %v3977_v2 }
 0x88f   :  { %3485 = vmatpush3.msra.mxu1 %v4640_v49 }
 0x890   :  { %3524 = vmatprep.subr.mxu1 %v3977_v2 }
 0x930   :  { %v1180_v20 = vpop.f32.mrf.mxu1 }
 0x931   :  { %v1184_v22 = vadd.f32 %v1180_v20, %v858_v18 }
 0x932   :  { %v3418_v23 = vpop.f32.mrf.mxu1 }
 0x933   :  { %3951 = vtanh.f32 %v1184_v22 }
 0x940   :  { %v4851_v24 = vpop.eup %3951 }
 0x941   :  { %3452 = vmatmul.mubr.f32.vlgmr.msra.gmra.mxu0 %v4851_v24 }
 0x942   :  { %3490 = vmatpush3.msra.mxu0 %v4536_v33  ;;  %3521 = vmatprep.mubr.msk.f32.mxu0 %vm3978_vm0, %v3977_v2 }
 0x943   :  { %3491 = vmatprep.subr.mxu0 %v3977_v2 }
 0x944   :  { %3492 = vmatpush3.msra.mxu0 %v4542_v34 }
 0x945   :  { %3493 = vmatprep.subr.mxu0 %v3977_v2 }
 0x946   :  { %3494 = vmatpush3.msra.mxu0 %v4549_v35 }
 0x947   :  { %3495 = vmatprep.subr.mxu0 %v3977_v2 }
 0x948   :  { %3496 = vmatpush3.msra.mxu0 %v4556_v36 }
 0x949   :  { %3497 = vmatprep.subr.mxu0 %v3977_v2 }
 0x94a   :  { %3498 = vmatpush3.msra.mxu0 %v4563_v37 }
 0x94b   :  { %3499 = vmatprep.subr.mxu0 %v3977_v2 }
 0x94c   :  { %3500 = vmatpush3.msra.mxu0 %v4570_v38 }
 0x94d   :  { %3501 = vmatprep.subr.mxu0 %v3977_v2 }
 0x94e   :  { %3502 = vmatpush3.msra.mxu0 %v4577_v39 }
 0x94f   :  { %3503 = vmatprep.subr.mxu0 %v3977_v2 }
 0x950   :  { %3504 = vmatpush3.msra.mxu0 %v4584_v40 }
 0x951   :  { %3505 = vmatprep.subr.mxu0 %v3977_v2 }
 0x952   :  { %3506 = vmatpush3.msra.mxu0 %v4591_v41 }
 0x953   :  { %3507 = vmatprep.subr.mxu0 %v3977_v2 }
 0x954   :  { %3508 = vmatpush3.msra.mxu0 %v4598_v42 }
 0x955   :  { %3509 = vmatprep.subr.mxu0 %v3977_v2 }
 0x956   :  { %3510 = vmatpush3.msra.mxu0 %v4605_v44 }
 0x957   :  { %3511 = vmatprep.subr.mxu0 %v3977_v2 }
 0x958   :  { %3512 = vmatpush3.msra.mxu0 %v4612_v45 }
 0x959   :  { %3513 = vmatprep.subr.mxu0 %v3977_v2 }
 0x95a   :  { %3514 = vmatpush3.msra.mxu0 %v4619_v46 }
 0x95b   :  { %3515 = vmatprep.subr.mxu0 %v3977_v2 }
 0x95c   :  { %3516 = vmatpush3.msra.mxu0 %v4626_v47 }
 0x95d   :  { %3517 = vmatprep.subr.mxu0 %v3977_v2 }
 0x95e   :  { %3518 = vmatpush3.msra.mxu0 %v4633_v48 }
 0x95f   :  { %3519 = vmatprep.subr.mxu0 %v3977_v2 }
 0x960   :  { %3520 = vmatpush3.msra.mxu0 %v4640_v49 }
 0x961   :  { %3559 = vmatprep.subr.mxu0 %v2387_v30 }
 0xa01   :  { %v1252_v26 = vpop.f32.mrf.mxu0 }
 0xa02   :  { %v1256_v27 = vadd.f32 %v1252_v26, %v863_v25 }
 0xa03   :  { %v3453_v28 = vpop.f32.mrf.mxu0 }
 0xa04   :  { %3953 = vtanh.f32 %v1256_v27 }
 0xa11   :  { %v4889_v29 = vpop.eup %3953 }
 0xa12   :  { %3487 = vmatmul.mubr.f32.vlgmr.msra.gmra.mxu1 %v4889_v29 }
 0xa13   :  { %3525 = vmatpush3.msra.mxu1 %v4536_v33  ;;  %3556 = vmatprep.mubr.msk.f32.mxu1 %vm3978_vm0, %v3977_v2 }
 0xa14   :  { %3526 = vmatprep.subr.mxu1 %v3977_v2 }
 0xa15   :  { %3527 = vmatpush3.msra.mxu1 %v4542_v34 }
 0xa16   :  { %3528 = vmatprep.subr.mxu1 %v3977_v2 }
 0xa17   :  { %3529 = vmatpush3.msra.mxu1 %v4549_v35 }
 0xa18   :  { %3530 = vmatprep.subr.mxu1 %v3977_v2 }
 0xa19   :  { %3531 = vmatpush3.msra.mxu1 %v4556_v36  ;;  %v2386_v36 = vld [vmem:[%s5460_s1 + $0x170] sm:$0xff] }
 0xa1a   :  { %3532 = vmatprep.subr.mxu1 %v3977_v2 }
 0xa1b   :  { %3533 = vmatpush3.msra.mxu1 %v4563_v37  ;;  %v2385_v37 = vld [vmem:[%s5460_s1 + $0x168] sm:$0xff] }
 0xa1c   :  { %3534 = vmatprep.subr.mxu1 %v3977_v2 }
 0xa1d   :  { %3535 = vmatpush3.msra.mxu1 %v4570_v38  ;;  %v2384_v38 = vld [vmem:[%s5460_s1 + $0x160] sm:$0xff] }
 0xa1e   :  { %3536 = vmatprep.subr.mxu1 %v3977_v2 }
 0xa1f   :  { %3537 = vmatpush3.msra.mxu1 %v4577_v39  ;;  %v2383_v39 = vld [vmem:[%s5460_s1 + $0x158] sm:$0xff] }
 0xa20   :  { %3538 = vmatprep.subr.mxu1 %v3977_v2 }
 0xa21   :  { %3539 = vmatpush3.msra.mxu1 %v4584_v40  ;;  %v2382_v40 = vld [vmem:[%s5460_s1 + $0x150] sm:$0xff] }
 0xa22   :  { %3540 = vmatprep.subr.mxu1 %v3977_v2 }
 0xa23   :  { %3541 = vmatpush3.msra.mxu1 %v4591_v41  ;;  %v2381_v41 = vld [vmem:[%s5460_s1 + $0x148] sm:$0xff] }
 0xa24   :  { %3542 = vmatprep.subr.mxu1 %v3977_v2 }
 0xa25   :  { %3543 = vmatpush3.msra.mxu1 %v4598_v42  ;;  %v2380_v42 = vld [vmem:[%s5460_s1 + $0x140] sm:$0xff] }
 0xa26   :  { %3544 = vmatprep.subr.mxu1 %v3977_v2 }
 0xa27   :  { %3545 = vmatpush3.msra.mxu1 %v4605_v44  ;;  %v2379_v44 = vld [vmem:[%s5460_s1 + $0x138] sm:$0xff] }
 0xa28   :  { %3546 = vmatprep.subr.mxu1 %v3977_v2 }
 0xa29   :  { %3547 = vmatpush3.msra.mxu1 %v4612_v45  ;;  %v2378_v45 = vld [vmem:[%s5460_s1 + $0x130] sm:$0xff] }
 0xa2a   :  { %3548 = vmatprep.subr.mxu1 %v3977_v2 }
 0xa2b   :  { %3549 = vmatpush3.msra.mxu1 %v4619_v46  ;;  %v2377_v46 = vld [vmem:[%s5460_s1 + $0x128] sm:$0xff] }
 0xa2c   :  { %3550 = vmatprep.subr.mxu1 %v3977_v2 }
 0xa2d   :  { %3551 = vmatpush3.msra.mxu1 %v4626_v47  ;;  %v2376_v47 = vld [vmem:[%s5460_s1 + $0x120] sm:$0xff] }
 0xa2e   :  { %3552 = vmatprep.subr.mxu1 %v3977_v2 }
 0xa2f   :  { %3553 = vmatpush3.msra.mxu1 %v4633_v48  ;;  %v2375_v48 = vld [vmem:[%s5460_s1 + $0x118] sm:$0xff] }
 0xa30   :  { %3554 = vmatprep.subr.mxu1 %v3977_v2 }
 0xa31   :  { %3555 = vmatpush3.msra.mxu1 %v4640_v49  ;;  %v2374_v49 = vld [vmem:[%s5460_s1 + $0x110] sm:$0xff] }
 0xa32   :  { %3603 = vmatprep.subr.mxu1 %v3977_v2 }
 0xad2   :  { %v1324_v32 = vpop.f32.mrf.mxu1 }
 0xad3   :  { %v1328_v33 = vadd.f32 %v1324_v32, %v868_v31 }
 0xad4   :  { %v3488_v34 = vpop.f32.mrf.mxu1 }
 0xad5   :  { %3955 = vtanh.f32 %v1328_v33 }
 0xae2   :  { %v3956_v35 = vpop.eup %3955 }
 0xae3   :  { %3522 = vmatmul.mubr.f32.vlgmr.msra.gmra.mxu0 %v3956_v35 }
 0xae4   :  { %3560 = vmatpush3.msra.mxu0 %v2387_v30  ;;  %3591 = vmatprep.mubr.f32.mxu0 %v4726_v5  ;;  %v5082_v5 = vld [vmem:[%s5461_s2 + $0x108] sm:$0xff] }
 0xae5   :  { %3561 = vmatprep.subr.mxu0 %v2386_v36 }
 0xae6   :  { %3562 = vmatpush3.msra.mxu0 %v2386_v36 }
 0xae7   :  { %3563 = vmatprep.subr.mxu0 %v2385_v37 }
 0xae8   :  { %3564 = vmatpush3.msra.mxu0 %v2385_v37 }
 0xae9   :  { %3565 = vmatprep.subr.mxu0 %v2384_v38 }
 0xaea   :  { %3566 = vmatpush3.msra.mxu0 %v2384_v38 }
 0xaeb   :  { %3567 = vmatprep.subr.mxu0 %v2383_v39 }
 0xaec   :  { %3568 = vmatpush3.msra.mxu0 %v2383_v39 }
 0xaed   :  { %3569 = vmatprep.subr.mxu0 %v2382_v40 }
 0xaee   :  { %3570 = vmatpush3.msra.mxu0 %v2382_v40 }
 0xaef   :  { %3571 = vmatprep.subr.mxu0 %v2381_v41 }
 0xaf0   :  { %3572 = vmatpush3.msra.mxu0 %v2381_v41 }
 0xaf1   :  { %3573 = vmatprep.subr.mxu0 %v2380_v42 }
 0xaf2   :  { %3574 = vmatpush3.msra.mxu0 %v2380_v42 }
 0xaf3   :  { %3575 = vmatprep.subr.mxu0 %v2379_v44 }
 0xaf4   :  { %3576 = vmatpush3.msra.mxu0 %v2379_v44 }
 0xaf5   :  { %3577 = vmatprep.subr.mxu0 %v2378_v45 }
 0xaf6   :  { %3578 = vmatpush3.msra.mxu0 %v2378_v45 }
 0xaf7   :  { %3579 = vmatprep.subr.mxu0 %v2377_v46 }
 0xaf8   :  { %3580 = vmatpush3.msra.mxu0 %v2377_v46 }
 0xaf9   :  { %3581 = vmatprep.subr.mxu0 %v2376_v47 }
 0xafa   :  { %3582 = vmatpush3.msra.mxu0 %v2376_v47 }
 0xafb   :  { %3583 = vmatprep.subr.mxu0 %v2375_v48 }
 0xafc   :  { %3584 = vmatpush3.msra.mxu0 %v2375_v48 }
 0xafd   :  { %3585 = vmatprep.subr.mxu0 %v2374_v49 }
 0xafe   :  { %3586 = vmatpush3.msra.mxu0 %v2374_v49  ;;  %v2212_v49 = vld [vmem:[%s5464_s4 + $0x78] sm:$0xff] }
 0xaff   :  { %3587 = vmatprep.subr.mxu0 %v2373_v50 }
 0xb00   :  { %3588 = vmatpush3.msra.mxu0 %v2373_v50 }
 0xb01   :  { %3589 = vmatprep.subr.mxu0 %v2372_v51 }
 0xb02   :  { %3590 = vmatpush3.msra.mxu0 %v2372_v51 }
 0xb03   :  { %3592 = vmatmul.mubr.f32.vlgmr.msra.gmra.mxu0 %v4774_v6  ;;  %3638 = vmatprep.subr.mxu0 %v3977_v2 }
 0xb04   :  { %3594 = vmatprep.mubr.f32.mxu0 %v4812_v16  ;;  %3639 = vmatpush3.msra.mxu0 %v4985_v52 }
 0xb05   :  { %3640 = vmatprep.subr.mxu0 %v3977_v2 }
 0xb06   :  { %3641 = vmatpush3.msra.mxu0 %v4991_v55 }
 0xb07   :  { %3595 = vmatmul.mubr.f32.gmra.mxu0 %v4851_v24  ;;  %3642 = vmatprep.subr.mxu0 %v3977_v2 }
 0xb08   :  { %3597 = vmatprep.mubr.f32.mxu0 %v4889_v29  ;;  %3643 = vmatpush3.msra.mxu0 %v4998_v56 }
 0xb09   :  { %3644 = vmatprep.subr.mxu0 %v3977_v2 }
 0xb0a   :  { %3645 = vmatpush3.msra.mxu0 %v5005_v54 }
 0xb0b   :  { %3598 = vmatmul.mubr.f32.gmra.mxu0 %v3956_v35  ;;  %3646 = vmatprep.subr.mxu0 %v3977_v2 }
 0xb0c   :  { %3647 = vmatpush3.msra.mxu0 %v5012_v57 }
 0xb0d   :  { %3648 = vmatprep.subr.mxu0 %v3977_v2 }
 0xb0e   :  { %3649 = vmatpush3.msra.mxu0 %v5019_v58 }
 0xb0f   :  { %3650 = vmatprep.subr.mxu0 %v3977_v2 }
 0xb10   :  { %3651 = vmatpush3.msra.mxu0 %v5026_v59 }
 0xb11   :  { %3652 = vmatprep.subr.mxu0 %v3977_v2 }
 0xb12   :  { %3653 = vmatpush3.msra.mxu0 %v5033_v60 }
 0xb13   :  { %3654 = vmatprep.subr.mxu0 %v3977_v2 }
 0xb14   :  { %3655 = vmatpush3.msra.mxu0 %v5040_v61 }
 0xb15   :  { %3656 = vmatprep.subr.mxu0 %v3977_v2 }
 0xb16   :  { %3657 = vmatpush3.msra.mxu0 %v5047_v62 }
 0xb17   :  { %3658 = vmatprep.subr.mxu0 %v3977_v2 }
 0xb18   :  { %3659 = vmatpush3.msra.mxu0 %v5054_v0 }
 0xb19   :  { %3660 = vmatprep.subr.mxu0 %v3977_v2 }
 0xb1a   :  { %3661 = vmatpush3.msra.mxu0 %v5061_v1 }
 0xb1b   :  { %3662 = vmatprep.subr.mxu0 %v3977_v2 }
 0xb1c   :  { %3663 = vmatpush3.msra.mxu0 %v5068_v43 }
 0xb1d   :  { %3664 = vmatprep.subr.mxu0 %v3977_v2 }
 0xb1e   :  { %3665 = vmatpush3.msra.mxu0 %v5075_v53 }
 0xb1f   :  { %3666 = vmatprep.subr.mxu0 %v3977_v2 }
 0xb20   :  { %3667 = vmatpush3.msra.mxu0 %v5082_v5 }
 0xb21   :  { %3668 = vmatprep.subr.mxu0 %v3977_v2 }
 0xb22   :  { %3669 = vmatpush3.msra.mxu0 %v5089_v7 }
 0xb23   :  { %3708 = vmatprep.subr.mxu0 %v3977_v2 }
 0xba3   :  { %v1396_v11 = vpop.f32.mrf.mxu0 }
 0xba4   :  { %v1400_v13 = vadd.f32 %v1396_v11, %v873_v9  ;;  %v2197_v9 = vld [vmem:[%s5464_s4] sm:$0xff] }
 0xba5   :  { %v3523_v19 = vpop.f32.mrf.mxu0 }
 0xba6   :  { %3957 = vtanh.f32 %v1400_v13 }
 0xbb3   :  { %v3958_v21 = vpop.eup %3957 }
 0xbb4   :  { %3557 = vmatmul.mubr.f32.vlgmr.msra.gmra.mxu1 %v3958_v21  ;;  %3600 = vmatprep.mubr.f32.mxu0 %v3958_v21 }
 0xbb5   :  { %3604 = vmatpush3.msra.mxu1 %v4985_v52  ;;  %3635 = vmatprep.mubr.msk.f32.mxu1 %vm3978_vm0, %v3977_v2 }
 0xbb6   :  { %3605 = vmatprep.subr.mxu1 %v3977_v2 }
 0xbb7   :  { %3606 = vmatpush3.msra.mxu1 %v4991_v55 }
 0xbb8   :  { %3607 = vmatprep.subr.mxu1 %v3977_v2 }
 0xbb9   :  { %3608 = vmatpush3.msra.mxu1 %v4998_v56 }
 0xbba   :  { %3609 = vmatprep.subr.mxu1 %v3977_v2 }
 0xbbb   :  { %3610 = vmatpush3.msra.mxu1 %v5005_v54 }
 0xbbc   :  { %3611 = vmatprep.subr.mxu1 %v3977_v2 }
 0xbbd   :  { %3612 = vmatpush3.msra.mxu1 %v5012_v57 }
 0xbbe   :  { %3613 = vmatprep.subr.mxu1 %v3977_v2 }
 0xbbf   :  { %3614 = vmatpush3.msra.mxu1 %v5019_v58 }
 0xbc0   :  { %3615 = vmatprep.subr.mxu1 %v3977_v2 }
 0xbc1   :  { %3616 = vmatpush3.msra.mxu1 %v5026_v59 }
 0xbc2   :  { %3617 = vmatprep.subr.mxu1 %v3977_v2 }
 0xbc3   :  { %3618 = vmatpush3.msra.mxu1 %v5033_v60  ;;  %v3593_v10 = vpop.f32.mrf.mxu0 }
 0xbc4   :  { %3619 = vmatprep.subr.mxu1 %v3977_v2  ;;  %v1571_v28 = vadd.f32 %v3593_v10, %v5172_v14 }
 0xbc5   :  { %3620 = vmatpush3.msra.mxu1 %v5040_v61  ;;  %v1565_v12 = vpop.f32.mrf.mxu0 }
 0xbc6   :  { %3621 = vmatprep.subr.mxu1 %v3977_v2  ;;  %v1566_v16 = vadd.f32 %v5172_v14, %v1565_v12 }
 0xbc7   :  { %3622 = vmatpush3.msra.mxu1 %v5047_v62  ;;  %v5212_v22 = vpop.f32.mrf.mxu0 }
 0xbc8   :  { %3623 = vmatprep.subr.mxu1 %v3977_v2  ;;  %v1581_v38 = vadd.f32 %v5212_v22, %v5172_v14 }
 0xbc9   :  { %3624 = vmatpush3.msra.mxu1 %v5054_v0  ;;  %v1575_v23 = vpop.f32.mrf.mxu0 }
 0xbca   :  { %3625 = vmatprep.subr.mxu1 %v3977_v2  ;;  %v1576_v33 = vadd.f32 %v5172_v14, %v1575_v23 }
 0xbcb   :  { %3626 = vmatpush3.msra.mxu1 %v5061_v1  ;;  %v5214_v24 = vpop.f32.mrf.mxu0 }
 0xbcc   :  { %3627 = vmatprep.subr.mxu1 %v3977_v2  ;;  %v1591_v50 = vadd.f32 %v5214_v24, %v5172_v14 }
 0xbcd   :  { %3628 = vmatpush3.msra.mxu1 %v5068_v43  ;;  %v5216_v25 = vpop.f32.mrf.mxu0 }
 0xbce   :  { %3629 = vmatprep.subr.mxu1 %v3977_v2  ;;  %v1586_v44 = vadd.f32 %v5172_v14, %v5216_v25 }
 0xbcf   :  { %3630 = vmatpush3.msra.mxu1 %v5075_v53 }
 0xbd0   :  { %3631 = vmatprep.subr.mxu1 %v3977_v2 }
 0xbd1   :  { %3632 = vmatpush3.msra.mxu1 %v5082_v5 }
 0xbd2   :  { %3633 = vmatprep.subr.mxu1 %v3977_v2 }
 0xbd3   :  { %3634 = vmatpush3.msra.mxu1 %v5089_v7 }
 0xbd4   :  { %3636 = vmatmul.mubr.f32.vlgmr.msra.gmra.mxu1 %v3977_v2  ;;  %3673 = vmatprep.subr.mxu1 %v3977_v2 }
 0xbd5   :  { %3674 = vmatpush3.msra.mxu1 %v4985_v52  ;;  %3705 = vmatprep.mubr.msk.f32.mxu1 %vm3978_vm0, %v3977_v2 }
 0xbd6   :  { %3675 = vmatprep.subr.mxu1 %v3977_v2 }
 0xbd7   :  { %3676 = vmatpush3.msra.mxu1 %v4991_v55 }
 0xbd8   :  { %3677 = vmatprep.subr.mxu1 %v3977_v2 }
 0xbd9   :  { %3678 = vmatpush3.msra.mxu1 %v4998_v56 }
 0xbda   :  { %3679 = vmatprep.subr.mxu1 %v3977_v2 }
 0xbdb   :  { %3680 = vmatpush3.msra.mxu1 %v5005_v54 }
 0xbdc   :  { %3681 = vmatprep.subr.mxu1 %v3977_v2 }
 0xbdd   :  { %3682 = vmatpush3.msra.mxu1 %v5012_v57 }
 0xbde   :  { %3683 = vmatprep.subr.mxu1 %v3977_v2 }
 0xbdf   :  { %3684 = vmatpush3.msra.mxu1 %v5019_v58 }
 0xbe0   :  { %3685 = vmatprep.subr.mxu1 %v3977_v2 }
 0xbe1   :  { %3686 = vmatpush3.msra.mxu1 %v5026_v59 }
 0xbe2   :  { %3687 = vmatprep.subr.mxu1 %v3977_v2 }
 0xbe3   :  { %3688 = vmatpush3.msra.mxu1 %v5033_v60 }
 0xbe4   :  { %3689 = vmatprep.subr.mxu1 %v3977_v2 }
 0xbe5   :  { %3690 = vmatpush3.msra.mxu1 %v5040_v61 }
 0xbe6   :  { %3691 = vmatprep.subr.mxu1 %v3977_v2 }
 0xbe7   :  { %3692 = vmatpush3.msra.mxu1 %v5047_v62 }
 0xbe8   :  { %3693 = vmatprep.subr.mxu1 %v3977_v2 }
 0xbe9   :  { %3694 = vmatpush3.msra.mxu1 %v5054_v0 }
 0xbea   :  { %3695 = vmatprep.subr.mxu1 %v3977_v2 }
 0xbeb   :  { %3696 = vmatpush3.msra.mxu1 %v5061_v1 }
 0xbec   :  { %3697 = vmatprep.subr.mxu1 %v3977_v2 }
 0xbed   :  { %3698 = vmatpush3.msra.mxu1 %v5068_v43 }
 0xbee   :  { %3699 = vmatprep.subr.mxu1 %v3977_v2 }
 0xbef   :  { %3700 = vmatpush3.msra.mxu1 %v5075_v53 }
 0xbf0   :  { %3701 = vmatprep.subr.mxu1 %v3977_v2 }
 0xbf1   :  { %3702 = vmatpush3.msra.mxu1 %v5082_v5 }
 0xbf2   :  { %3703 = vmatprep.subr.mxu1 %v3977_v2 }
 0xbf3   :  { %3704 = vmatpush3.msra.mxu1 %v5089_v7 }
 0xbf4   :  { %3743 = vmatprep.subr.mxu1 %v3977_v2 }
 0xc74   :  { %v1468_v3 = vpop.f32.mrf.mxu1 }
 0xc75   :  { %v1472_v4 = vadd.f32 %v1468_v3, %v878_v17  ;;  %v2406_v3 = vld [vmem:[%s5465_s5] ss:$0 sm:$0xff] }
 0xc76   :  { %v3558_v6 = vpop.f32.mrf.mxu1 }
 0xc77   :  { %3959 = vtanh.f32 %v1472_v4 }
 0xc84   :  { %v3960_v8 = vpop.eup %3959 }
 0xc85   :  { %3601 = vmatmul.mubr.f32.gmra.mxu0 %v3960_v8 }
 0xc86   :  { %3670 = vmatprep.mubr.msk.f32.mxu0 %vm3978_vm0, %v3977_v2 }
 0xc94   :  { %v1687_v18 = vpop.f32.mrf.mxu1 }
 0xc95   :  { %v1691_v63 = vadd.f32 %v1687_v18, %v1566_v16 }
 0xc96   :  { %v3637_v15 = vpop.f32.mrf.mxu1 }
 0xc97   :  { %3961 = vtanh.f32 %v1691_v63 }
 0xca4   :  { %v5175_v20 = vpop.eup %3961 }
 0xca5   :  { %3671 = vmatmul.mubr.f32.vlgmr.msra.gmra.mxu0 %v5175_v20 }
 0xca6   :  { %3709 = vmatpush3.msra.mxu0 %v4985_v52  ;;  %3740 = vmatprep.mubr.msk.f32.mxu0 %vm3978_vm0, %v3977_v2 }
 0xca7   :  { %3710 = vmatprep.subr.mxu0 %v3977_v2 }
 0xca8   :  { %3711 = vmatpush3.msra.mxu0 %v4991_v55 }
 0xca9   :  { %3712 = vmatprep.subr.mxu0 %v3977_v2 }
 0xcaa   :  { %3713 = vmatpush3.msra.mxu0 %v4998_v56 }
 0xcab   :  { %3714 = vmatprep.subr.mxu0 %v3977_v2 }
 0xcac   :  { %3715 = vmatpush3.msra.mxu0 %v5005_v54 }
 0xcad   :  { %3716 = vmatprep.subr.mxu0 %v3977_v2 }
 0xcae   :  { %3717 = vmatpush3.msra.mxu0 %v5012_v57 }
 0xcaf   :  { %3718 = vmatprep.subr.mxu0 %v3977_v2 }
 0xcb0   :  { %3719 = vmatpush3.msra.mxu0 %v5019_v58 }
 0xcb1   :  { %3720 = vmatprep.subr.mxu0 %v3977_v2 }
 0xcb2   :  { %3721 = vmatpush3.msra.mxu0 %v5026_v59 }
 0xcb3   :  { %3722 = vmatprep.subr.mxu0 %v3977_v2 }
 0xcb4   :  { %3723 = vmatpush3.msra.mxu0 %v5033_v60 }
 0xcb5   :  { %3724 = vmatprep.subr.mxu0 %v3977_v2 }
 0xcb6   :  { %3725 = vmatpush3.msra.mxu0 %v5040_v61 }
 0xcb7   :  { %3726 = vmatprep.subr.mxu0 %v3977_v2 }
 0xcb8   :  { %3727 = vmatpush3.msra.mxu0 %v5047_v62 }
 0xcb9   :  { %3728 = vmatprep.subr.mxu0 %v3977_v2 }
 0xcba   :  { %3729 = vmatpush3.msra.mxu0 %v5054_v0 }
 0xcbb   :  { %3730 = vmatprep.subr.mxu0 %v3977_v2 }
 0xcbc   :  { %3731 = vmatpush3.msra.mxu0 %v5061_v1 }
 0xcbd   :  { %3732 = vmatprep.subr.mxu0 %v3977_v2 }
 0xcbe   :  { %3733 = vmatpush3.msra.mxu0 %v5068_v43 }
 0xcbf   :  { %3734 = vmatprep.subr.mxu0 %v3977_v2 }
 0xcc0   :  { %3735 = vmatpush3.msra.mxu0 %v5075_v53 }
 0xcc1   :  { %3736 = vmatprep.subr.mxu0 %v3977_v2 }
 0xcc2   :  { %3737 = vmatpush3.msra.mxu0 %v5082_v5 }
 0xcc3   :  { %3738 = vmatprep.subr.mxu0 %v3977_v2 }
 0xcc4   :  { %3739 = vmatpush3.msra.mxu0 %v5089_v7 }
 0xcc5   :  { %3778 = vmatprep.subr.mxu0 %v3977_v2 }
 0xd45   :  { %v5218_v26 = vpop.f32.mrf.mxu0 }
 0xd46   :  { %v1601_v24 = vadd.f32 %v5218_v26, %v5172_v14 }
 0xd47   :  { %v5220_v27 = vpop.f32.mrf.mxu0 }
 0xd48   :  { %v1596_v11 = vadd.f32 %v5172_v14, %v5220_v27 }
 0xd65   :  { %v1759_v29 = vpop.f32.mrf.mxu0 }
 0xd66   :  { %v1763_v30 = vadd.f32 %v1759_v29, %v1571_v28 }
 0xd67   :  { %v3672_v31 = vpop.f32.mrf.mxu0 }
 0xd68   :  { %3963 = vtanh.f32 %v1763_v30 }
 0xd75   :  { %v5223_v32 = vpop.eup %3963 }
 0xd76   :  { %3706 = vmatmul.mubr.f32.vlgmr.msra.gmra.mxu1 %v5223_v32 }
 0xd77   :  { %3744 = vmatpush3.msra.mxu1 %v4985_v52  ;;  %3775 = vmatprep.mubr.msk.f32.mxu1 %vm3978_vm0, %v3977_v2 }
 0xd78   :  { %3745 = vmatprep.subr.mxu1 %v3977_v2 }
 0xd79   :  { %3746 = vmatpush3.msra.mxu1 %v4991_v55 }
 0xd7a   :  { %3747 = vmatprep.subr.mxu1 %v3977_v2 }
 0xd7b   :  { %3748 = vmatpush3.msra.mxu1 %v4998_v56 }
 0xd7c   :  { %3749 = vmatprep.subr.mxu1 %v3977_v2 }
 0xd7d   :  { %3750 = vmatpush3.msra.mxu1 %v5005_v54 }
 0xd7e   :  { %3751 = vmatprep.subr.mxu1 %v3977_v2 }
 0xd7f   :  { %3752 = vmatpush3.msra.mxu1 %v5012_v57 }
 0xd80   :  { %3753 = vmatprep.subr.mxu1 %v3977_v2 }
 0xd81   :  { %3754 = vmatpush3.msra.mxu1 %v5019_v58 }
 0xd82   :  { %3755 = vmatprep.subr.mxu1 %v3977_v2 }
 0xd83   :  { %3756 = vmatpush3.msra.mxu1 %v5026_v59 }
 0xd84   :  { %3757 = vmatprep.subr.mxu1 %v3977_v2 }
 0xd85   :  { %3758 = vmatpush3.msra.mxu1 %v5033_v60 }
 0xd86   :  { %3759 = vmatprep.subr.mxu1 %v3977_v2 }
 0xd87   :  { %3760 = vmatpush3.msra.mxu1 %v5040_v61 }
 0xd88   :  { %3761 = vmatprep.subr.mxu1 %v3977_v2 }
 0xd89   :  { %3762 = vmatpush3.msra.mxu1 %v5047_v62 }
 0xd8a   :  { %3763 = vmatprep.subr.mxu1 %v3977_v2 }
 0xd8b   :  { %3764 = vmatpush3.msra.mxu1 %v5054_v0 }
 0xd8c   :  { %3765 = vmatprep.subr.mxu1 %v3977_v2 }
 0xd8d   :  { %3766 = vmatpush3.msra.mxu1 %v5061_v1 }
 0xd8e   :  { %3767 = vmatprep.subr.mxu1 %v3977_v2 }
 0xd8f   :  { %3768 = vmatpush3.msra.mxu1 %v5068_v43 }
 0xd90   :  { %3769 = vmatprep.subr.mxu1 %v3977_v2 }
 0xd91   :  { %3770 = vmatpush3.msra.mxu1 %v5075_v53 }
 0xd92   :  { %3771 = vmatprep.subr.mxu1 %v3977_v2 }
 0xd93   :  { %3772 = vmatpush3.msra.mxu1 %v5082_v5 }
 0xd94   :  { %3773 = vmatprep.subr.mxu1 %v3977_v2 }
 0xd95   :  { %3774 = vmatpush3.msra.mxu1 %v5089_v7 }
 0xd96   :  { %3813 = vmatprep.subr.mxu1 %v3977_v2 }
 0xe36   :  { %v1831_v34 = vpop.f32.mrf.mxu1 }
 0xe37   :  { %v1835_v35 = vadd.f32 %v1831_v34, %v1576_v33 }
 0xe38   :  { %v3707_v36 = vpop.f32.mrf.mxu1 }
 0xe39   :  { %3965 = vtanh.f32 %v1835_v35 }
 0xe46   :  { %v5261_v37 = vpop.eup %3965 }
 0xe47   :  { %3741 = vmatmul.mubr.f32.vlgmr.msra.gmra.mxu0 %v5261_v37 }
 0xe48   :  { %3779 = vmatpush3.msra.mxu0 %v4985_v52  ;;  %3810 = vmatprep.mubr.msk.f32.mxu0 %vm3978_vm0, %v3977_v2 }
 0xe49   :  { %3780 = vmatprep.subr.mxu0 %v3977_v2 }
 0xe4a   :  { %3781 = vmatpush3.msra.mxu0 %v4991_v55 }
 0xe4b   :  { %3782 = vmatprep.subr.mxu0 %v3977_v2 }
 0xe4c   :  { %3783 = vmatpush3.msra.mxu0 %v4998_v56 }
 0xe4d   :  { %3784 = vmatprep.subr.mxu0 %v3977_v2 }
 0xe4e   :  { %3785 = vmatpush3.msra.mxu0 %v5005_v54 }
 0xe4f   :  { %3786 = vmatprep.subr.mxu0 %v3977_v2 }
 0xe50   :  { %3787 = vmatpush3.msra.mxu0 %v5012_v57 }
 0xe51   :  { %3788 = vmatprep.subr.mxu0 %v3977_v2 }
 0xe52   :  { %3789 = vmatpush3.msra.mxu0 %v5019_v58 }
 0xe53   :  { %3790 = vmatprep.subr.mxu0 %v3977_v2 }
 0xe54   :  { %3791 = vmatpush3.msra.mxu0 %v5026_v59 }
 0xe55   :  { %3792 = vmatprep.subr.mxu0 %v3977_v2 }
 0xe56   :  { %3793 = vmatpush3.msra.mxu0 %v5033_v60 }
 0xe57   :  { %3794 = vmatprep.subr.mxu0 %v3977_v2 }
 0xe58   :  { %3795 = vmatpush3.msra.mxu0 %v5040_v61 }
 0xe59   :  { %3796 = vmatprep.subr.mxu0 %v3977_v2 }
 0xe5a   :  { %3797 = vmatpush3.msra.mxu0 %v5047_v62 }
 0xe5b   :  { %3798 = vmatprep.subr.mxu0 %v3977_v2 }
 0xe5c   :  { %3799 = vmatpush3.msra.mxu0 %v5054_v0 }
 0xe5d   :  { %3800 = vmatprep.subr.mxu0 %v3977_v2 }
 0xe5e   :  { %3801 = vmatpush3.msra.mxu0 %v5061_v1 }
 0xe5f   :  { %3802 = vmatprep.subr.mxu0 %v3977_v2 }
 0xe60   :  { %3803 = vmatpush3.msra.mxu0 %v5068_v43 }
 0xe61   :  { %3804 = vmatprep.subr.mxu0 %v3977_v2 }
 0xe62   :  { %3805 = vmatpush3.msra.mxu0 %v5075_v53 }
 0xe63   :  { %3806 = vmatprep.subr.mxu0 %v3977_v2 }
 0xe64   :  { %3807 = vmatpush3.msra.mxu0 %v5082_v5 }
 0xe65   :  { %3808 = vmatprep.subr.mxu0 %v3977_v2 }
 0xe66   :  { %3809 = vmatpush3.msra.mxu0 %v5089_v7 }
 0xe67   :  { %3848 = vmatprep.subr.mxu0 %v3977_v2 }
 0xf07   :  { %v1903_v39 = vpop.f32.mrf.mxu0 }
 0xf08   :  { %v1907_v40 = vadd.f32 %v1903_v39, %v1581_v38 }
 0xf09   :  { %v3742_v41 = vpop.f32.mrf.mxu0 }
 0xf0a   :  { %3967 = vtanh.f32 %v1907_v40 }
 0xf17   :  { %v5300_v42 = vpop.eup %3967 }
 0xf18   :  { %3776 = vmatmul.mubr.f32.vlgmr.msra.gmra.mxu1 %v5300_v42 }
 0xf19   :  { %3814 = vmatpush3.msra.mxu1 %v4985_v52  ;;  %3845 = vmatprep.mubr.msk.f32.mxu1 %vm3978_vm0, %v3977_v2 }
 0xf1a   :  { %3815 = vmatprep.subr.mxu1 %v3977_v2 }
 0xf1b   :  { %3816 = vmatpush3.msra.mxu1 %v4991_v55 }
 0xf1c   :  { %3817 = vmatprep.subr.mxu1 %v3977_v2 }
 0xf1d   :  { %3818 = vmatpush3.msra.mxu1 %v4998_v56 }
 0xf1e   :  { %3819 = vmatprep.subr.mxu1 %v3977_v2 }
 0xf1f   :  { %3820 = vmatpush3.msra.mxu1 %v5005_v54 }
 0xf20   :  { %3821 = vmatprep.subr.mxu1 %v3977_v2 }
 0xf21   :  { %3822 = vmatpush3.msra.mxu1 %v5012_v57 }
 0xf22   :  { %3823 = vmatprep.subr.mxu1 %v3977_v2 }
 0xf23   :  { %3824 = vmatpush3.msra.mxu1 %v5019_v58 }
 0xf24   :  { %3825 = vmatprep.subr.mxu1 %v3977_v2 }
 0xf25   :  { %3826 = vmatpush3.msra.mxu1 %v5026_v59 }
 0xf26   :  { %3827 = vmatprep.subr.mxu1 %v3977_v2 }
 0xf27   :  { %3828 = vmatpush3.msra.mxu1 %v5033_v60 }
 0xf28   :  { %3829 = vmatprep.subr.mxu1 %v3977_v2 }
 0xf29   :  { %3830 = vmatpush3.msra.mxu1 %v5040_v61 }
 0xf2a   :  { %3831 = vmatprep.subr.mxu1 %v3977_v2 }
 0xf2b   :  { %3832 = vmatpush3.msra.mxu1 %v5047_v62 }
 0xf2c   :  { %3833 = vmatprep.subr.mxu1 %v3977_v2 }
 0xf2d   :  { %3834 = vmatpush3.msra.mxu1 %v5054_v0 }
 0xf2e   :  { %3835 = vmatprep.subr.mxu1 %v3977_v2 }
 0xf2f   :  { %3836 = vmatpush3.msra.mxu1 %v5061_v1 }
 0xf30   :  { %3837 = vmatprep.subr.mxu1 %v3977_v2 }
 0xf31   :  { %3838 = vmatpush3.msra.mxu1 %v5068_v43 }
 0xf32   :  { %3839 = vmatprep.subr.mxu1 %v3977_v2 }
 0xf33   :  { %3840 = vmatpush3.msra.mxu1 %v5075_v53 }
 0xf34   :  { %3841 = vmatprep.subr.mxu1 %v3977_v2 }
 0xf35   :  { %3842 = vmatpush3.msra.mxu1 %v5082_v5 }
 0xf36   :  { %3843 = vmatprep.subr.mxu1 %v3977_v2 }
 0xf37   :  { %3844 = vmatpush3.msra.mxu1 %v5089_v7 }
 0xf38   :  { %3883 = vmatprep.subr.mxu1 %v2212_v49 }
 0xfd8   :  { %v1975_v45 = vpop.f32.mrf.mxu1 }
 0xfd9   :  { %v1979_v46 = vadd.f32 %v1975_v45, %v1586_v44 }
 0xfda   :  { %v3777_v47 = vpop.f32.mrf.mxu1 }
 0xfdb   :  { %3969 = vtanh.f32 %v1979_v46 }
 0xfe8   :  { %v5338_v48 = vpop.eup %3969 }
 0xfe9   :  { %3811 = vmatmul.mubr.f32.vlgmr.msra.gmra.mxu0 %v5338_v48 }
 0xfea   :  { %3849 = vmatpush3.msra.mxu0 %v4985_v52  ;;  %3880 = vmatprep.mubr.msk.f32.mxu0 %vm3978_vm0, %v3977_v2 }
 0xfeb   :  { %3850 = vmatprep.subr.mxu0 %v3977_v2 }
 0xfec   :  { %3851 = vmatpush3.msra.mxu0 %v4991_v55 }
 0xfed   :  { %3852 = vmatprep.subr.mxu0 %v3977_v2 }
 0xfee   :  { %3853 = vmatpush3.msra.mxu0 %v4998_v56 }
 0xfef   :  { %3854 = vmatprep.subr.mxu0 %v3977_v2 }
 0xff0   :  { %3855 = vmatpush3.msra.mxu0 %v5005_v54  ;;  %v2211_v54 = vld [vmem:[%s5464_s4 + $0x70] sm:$0xff] }
 0xff1   :  { %3856 = vmatprep.subr.mxu0 %v3977_v2 }
 0xff2   :  { %3857 = vmatpush3.msra.mxu0 %v5012_v57  ;;  %v2209_v57 = vld [vmem:[%s5464_s4 + $0x60] sm:$0xff] }
 0xff3   :  { %3858 = vmatprep.subr.mxu0 %v3977_v2 }
 0xff4   :  { %3859 = vmatpush3.msra.mxu0 %v5019_v58  ;;  %v2208_v58 = vld [vmem:[%s5464_s4 + $0x58] sm:$0xff] }
 0xff5   :  { %3860 = vmatprep.subr.mxu0 %v3977_v2 }
 0xff6   :  { %3861 = vmatpush3.msra.mxu0 %v5026_v59  ;;  %v2207_v59 = vld [vmem:[%s5464_s4 + $0x50] sm:$0xff] }
 0xff7   :  { %3862 = vmatprep.subr.mxu0 %v3977_v2 }
 0xff8   :  { %3863 = vmatpush3.msra.mxu0 %v5033_v60  ;;  %v2206_v60 = vld [vmem:[%s5464_s4 + $0x48] sm:$0xff] }
 0xff9   :  { %3864 = vmatprep.subr.mxu0 %v3977_v2 }
 0xffa   :  { %3865 = vmatpush3.msra.mxu0 %v5040_v61  ;;  %v2205_v61 = vld [vmem:[%s5464_s4 + $0x40] sm:$0xff] }
 0xffb   :  { %3866 = vmatprep.subr.mxu0 %v3977_v2 }
 0xffc   :  { %3867 = vmatpush3.msra.mxu0 %v5047_v62  ;;  %v2204_v62 = vld [vmem:[%s5464_s4 + $0x38] sm:$0xff] }
 0xffd   :  { %3868 = vmatprep.subr.mxu0 %v3977_v2 }
 0xffe   :  { %3869 = vmatpush3.msra.mxu0 %v5054_v0  ;;  %v2203_v0 = vld [vmem:[%s5464_s4 + $0x30] sm:$0xff] }
 0xfff   :  { %3870 = vmatprep.subr.mxu0 %v3977_v2 }
0x1000   :  { %3871 = vmatpush3.msra.mxu0 %v5061_v1  ;;  %v2202_v1 = vld [vmem:[%s5464_s4 + $0x28] sm:$0xff] }
0x1001   :  { %3872 = vmatprep.subr.mxu0 %v3977_v2 }
0x1002   :  { %3873 = vmatpush3.msra.mxu0 %v5068_v43  ;;  %v2201_v43 = vld [vmem:[%s5464_s4 + $0x20] sm:$0xff] }
0x1003   :  { %3874 = vmatprep.subr.mxu0 %v3977_v2 }
0x1004   :  { %3875 = vmatpush3.msra.mxu0 %v5075_v53  ;;  %v2200_v53 = vld [vmem:[%s5464_s4 + $0x18] sm:$0xff] }
0x1005   :  { %3876 = vmatprep.subr.mxu0 %v3977_v2 }
0x1006   :  { %3877 = vmatpush3.msra.mxu0 %v5082_v5  ;;  %v2199_v5 = vld [vmem:[%s5464_s4 + $0x10] sm:$0xff] }
0x1007   :  { %3878 = vmatprep.subr.mxu0 %v3977_v2  ;;  %v2210_v2 = vld [vmem:[%s5464_s4 + $0x68] sm:$0xff] }
0x1008   :  { %3879 = vmatpush3.msra.mxu0 %v5089_v7  ;;  %v2198_v7 = vld [vmem:[%s5464_s4 + $0x8] sm:$0xff] }
0x10a9   :  { %v2047_v51 = vpop.f32.mrf.mxu0 }
0x10aa   :  { %v2051_v52 = vadd.f32 %v2047_v51, %v1591_v50 }
0x10ab   :  { %v3812_v55 = vpop.f32.mrf.mxu0 }
0x10ac   :  { %3971 = vtanh.f32 %v2051_v52 }
0x10b9   :  { %v3972_v56 = vpop.eup %3971 }
0x10ba   :  { %3846 = vmatmul.mubr.f32.vlgmr.msra.gmra.mxu1 %v3972_v56 }
0x10bb   :  { %3884 = vmatpush3.msra.mxu1 %v2212_v49  ;;  %3915 = vmatprep.mubr.f32.mxu1 %v5175_v20 }
0x10bc   :  { %3885 = vmatprep.subr.mxu1 %v2211_v54 }
0x10bd   :  { %3886 = vmatpush3.msra.mxu1 %v2211_v54 }
0x10be   :  { %3887 = vmatprep.subr.mxu1 %v2210_v2 }
0x10bf   :  { %3888 = vmatpush3.msra.mxu1 %v2210_v2 }
0x10c0   :  { %3889 = vmatprep.subr.mxu1 %v2209_v57 }
0x10c1   :  { %3890 = vmatpush3.msra.mxu1 %v2209_v57 }
0x10c2   :  { %3891 = vmatprep.subr.mxu1 %v2208_v58 }
0x10c3   :  { %3892 = vmatpush3.msra.mxu1 %v2208_v58 }
0x10c4   :  { %3893 = vmatprep.subr.mxu1 %v2207_v59 }
0x10c5   :  { %3894 = vmatpush3.msra.mxu1 %v2207_v59 }
0x10c6   :  { %3895 = vmatprep.subr.mxu1 %v2206_v60 }
0x10c7   :  { %3896 = vmatpush3.msra.mxu1 %v2206_v60 }
0x10c8   :  { %3897 = vmatprep.subr.mxu1 %v2205_v61 }
0x10c9   :  { %3898 = vmatpush3.msra.mxu1 %v2205_v61 }
0x10ca   :  { %3899 = vmatprep.subr.mxu1 %v2204_v62 }
0x10cb   :  { %3900 = vmatpush3.msra.mxu1 %v2204_v62 }
0x10cc   :  { %3901 = vmatprep.subr.mxu1 %v2203_v0 }
0x10cd   :  { %3902 = vmatpush3.msra.mxu1 %v2203_v0 }
0x10ce   :  { %3903 = vmatprep.subr.mxu1 %v2202_v1 }
0x10cf   :  { %3904 = vmatpush3.msra.mxu1 %v2202_v1 }
0x10d0   :  { %3905 = vmatprep.subr.mxu1 %v2201_v43 }
0x10d1   :  { %3906 = vmatpush3.msra.mxu1 %v2201_v43 }
0x10d2   :  { %3907 = vmatprep.subr.mxu1 %v2200_v53 }
0x10d3   :  { %3908 = vmatpush3.msra.mxu1 %v2200_v53 }
0x10d4   :  { %3909 = vmatprep.subr.mxu1 %v2199_v5 }
0x10d5   :  { %3910 = vmatpush3.msra.mxu1 %v2199_v5 }
0x10d6   :  { %3911 = vmatprep.subr.mxu1 %v2198_v7 }
0x10d7   :  { %3912 = vmatpush3.msra.mxu1 %v2198_v7 }
0x10d8   :  { %3913 = vmatprep.subr.mxu1 %v2197_v9 }
0x10d9   :  { %3914 = vmatpush3.msra.mxu1 %v2197_v9 }
0x10da   :  { %3916 = vmatmul.mubr.f32.vlgmr.msra.gmra.mxu1 %v5223_v32 }
0x10db   :  { %3918 = vmatprep.mubr.f32.mxu1 %v5261_v37 }
0x10de   :  { %3919 = vmatmul.mubr.f32.gmra.mxu1 %v5300_v42 }
0x10df   :  { %3921 = vmatprep.mubr.f32.mxu1 %v5338_v48 }
0x10e2   :  { %3922 = vmatmul.mubr.f32.gmra.mxu1 %v3972_v56 }
0x117a   :  { %v2119_v13 = vpop.f32.mrf.mxu1 }
0x117b   :  { %v2123_v19 = vadd.f32 %v2119_v13, %v1596_v11 }
0x117c   :  { %v3847_v21 = vpop.f32.mrf.mxu1 }
0x117d   :  { %3973 = vtanh.f32 %v2123_v19 }
0x118a   :  { %v3974_v17 = vpop.eup %3973 }
0x118b   :  { %3881 = vmatmul.mubr.f32.vlgmr.msra.gmra.mxu0 %v3974_v17  ;;  %3924 = vmatprep.mubr.f32.mxu1 %v3974_v17 }
0x119a   :  { %v3917_v4 = vpop.f32.mrf.mxu1 }
0x119b   :  { %v2292_v6 = vadd.f32 %v3917_v4, %v2406_v3 }
0x119c   :  { %v2286_v8 = vpop.f32.mrf.mxu1 }
0x119d   :  { %2326 = vst [vmem:[%s5466_s6 + $0x8] sm:$0xff] %v2292_v6  ;;  %v2287_v10 = vadd.f32 %v2406_v3, %v2286_v8 }
0x119e   :  { %v3920_v12 = vpop.f32.mrf.mxu1 }
0x119f   :  { %2325 = vst [vmem:[%s5466_s6] sm:$0xff] %v2287_v10  ;;  %v2302_v16 = vadd.f32 %v3920_v12, %v2406_v3 }
0x11a0   :  { %v2296_v18 = vpop.f32.mrf.mxu1 }
0x11a1   :  { %2328 = vst [vmem:[%s5466_s6 + $0x18] sm:$0xff] %v2302_v16  ;;  %v2297_v63 = vadd.f32 %v2406_v3, %v2296_v18 }
0x11a2   :  { %v3923_v15 = vpop.f32.mrf.mxu1 }
0x11a3   :  { %2327 = vst [vmem:[%s5466_s6 + $0x10] sm:$0xff] %v2297_v63  ;;  %v2312_v20 = vadd.f32 %v3923_v15, %v2406_v3 }
0x11a4   :  { %v2306_v22 = vpop.f32.mrf.mxu1 }
0x11a5   :  { %2330 = vst [vmem:[%s5466_s6 + $0x28] sm:$0xff] %v2312_v20  ;;  %v2307_v23 = vadd.f32 %v2406_v3, %v2306_v22 }
0x11a7   :  { %2329 = vst [vmem:[%s5466_s6 + $0x20] sm:$0xff] %v2307_v23 }
0x124b   :  { %v2191_v25 = vpop.f32.mrf.mxu0 }
0x124c   :  { %v2195_v27 = vadd.f32 %v2191_v25, %v1601_v24 }
0x124d   :  { %v3882_v28 = vpop.f32.mrf.mxu0 }
0x124e   :  { %3975 = vtanh.f32 %v2195_v27 }
0x125b   :  { %v3976_v29 = vpop.eup %3975 }
0x125c   :  { %3925 = vmatmul.mubr.f32.gmra.mxu1 %v3976_v29 }
0x131c   :  { %v3926_v30 = vpop.f32.mrf.mxu1 }
0x131d   :  { %v2322_v31 = vadd.f32 %v3926_v30, %v2406_v3 }
0x131e   :  { %v2316_v32 = vpop.f32.mrf.mxu1 }
0x131f   :  { %2332 = vst [vmem:[%s5466_s6 + $0x38] sm:$0xff] %v2322_v31  ;;  %v2317_v33 = vadd.f32 %v2406_v3, %v2316_v32 }
0x1321   :  { %2331 = vst [vmem:[%s5466_s6 + $0x30] sm:$0xff] %v2317_v33 }

</bundles_post_ra>
